<compile_context>
chip_gen: v7x
topology: tpu7x:2x2x1
jax: 0.10.0
libtpu: 0.0.40
codegen_flags: <defaults>
</compile_context>

<pallas_src>
import functools

import jax
import jax.numpy as jnp
from jax import lax
from jax.experimental import pallas as pl
from jax.experimental.pallas import tpu as pltpu


def _relu6(x):
    return jnp.clip(x, 0.0, 6.0)


def _round_up(n, m):
    return ((n + m - 1) // m) * m


def cnnlstm_kernel(x_ref, w_ih_ref, w_hh_t_ref, b_ref, w_out_t_ref, b_out_ref,
                   y_ref, *, gate_pad, seq_len):
    """Whole forward (LSTM recurrence + output head) in one kernel invocation.

    x_ref      : (T, Bp)        time-major input (feature dim == 1, squeezed)
    w_ih_ref   : (1, 4*GP)      input->gate weights, per-gate 128-lane padded
    w_hh_t_ref : (GP, 4*GP)     hidden->gate weights, transposed + padded for h @ W
    b_ref      : (1, 4*GP)      combined bias b_ih + b_hh, padded
    w_out_t_ref: (GP, OUTP)     output linear weights, transposed + padded
    b_out_ref  : (1, OUTP)      output linear bias, padded
    y_ref      : (Bp, OUTP)     result (lane-dense; wrapper slices to (B, out_dim))
    Gate order is (i, f, g, o), matching torch.nn.LSTM.
    """
    GP = gate_pad
    x_tb = x_ref[...]                       # (T, Bp)
    w_ih = w_ih_ref[...]                    # (1, 4*GP)
    w_hh_t = w_hh_t_ref[...]                # (GP, 4*GP)
    b = b_ref[...]                          # (1, 4*GP)
    Bp = x_tb.shape[1]

    # Hoist every x-dependent / bias term out of the recurrence: one vectorized
    # VPU pass over all T steps; the serial chain is left with only `+ h @ W_hh`.
    pre_gates = x_tb[:, :, None] * w_ih[None] + b[None]     # (T, Bp, 4*GP)

    h = jnp.zeros((Bp, GP), jnp.float32)
    c = jnp.zeros((Bp, GP), jnp.float32)

    # seq_len is small and static: fully unrolled loop -> static leading-axis
    # indexing of pre_gates and full scheduler visibility across steps.
    for t in range(seq_len):
        gates = pre_gates[t] + jnp.dot(h, w_hh_t,
                                       preferred_element_type=jnp.float32)  # (Bp, 4*GP)
        # 128-lane-aligned static gate slices (no cross-lane rotations).
        i = jax.nn.sigmoid(gates[:, 0 * GP:1 * GP])
        f = jax.nn.sigmoid(gates[:, 1 * GP:2 * GP])
        g = jnp.tanh(gates[:, 2 * GP:3 * GP])
        o = jax.nn.sigmoid(gates[:, 3 * GP:4 * GP])
        c = f * c + i * g
        h = o * jnp.tanh(c)

    # Output head fused right after the last unrolled step (same invocation).
    # lstm_out = ReLU6(lstm_out); y = ReLU6(Linear(lstm_out[:, -1, :]))
    h_act = _relu6(h)
    y = jnp.dot(h_act, w_out_t_ref[...],
                preferred_element_type=jnp.float32) + b_out_ref[...]
    y_ref[...] = _relu6(y)
    # TODO(synk): losstype == 'div' log_softmax branch not exercised (losstype=None).


def cnnlstm_forward(x, params, *, hidden, seq_len, out_dim):
    w_ih, w_hh, b_ih, b_hh, w_out, b_out = params
    B = x.shape[0]
    H = hidden
    f32 = jnp.float32

    GP = _round_up(max(H, 1), 128)         # per-gate lane width (vreg aligned)
    Bp = _round_up(max(B, 1), 8)           # sublane-aligned batch
    OUTP = _round_up(max(out_dim, 1), 128)  # lane-dense output

    # --- per-gate 128-lane padded weight layouts (gate order i, f, g, o) ---
    # w_ih : (4H, 1) -> (1, 4*GP), zero-padded per gate.
    w_ih_pad = jnp.zeros((4, GP), f32).at[:, :H].set(w_ih.reshape(4, H).astype(f32))
    w_ih_pad = w_ih_pad.reshape(1, 4 * GP)
    # combined bias : (1, 4*GP)
    b_pad = jnp.zeros((4, GP), f32).at[:, :H].set(
        (b_ih + b_hh).reshape(4, H).astype(f32)).reshape(1, 4 * GP)
    # w_hh : (4H, H) -> (GP, 4*GP) with W[j, k*GP + m] = w_hh[k*H + m, j];
    # padded rows/cols are zero so padded lanes stay exactly zero in the recurrence.
    w_hh_g = jnp.transpose(w_hh.reshape(4, H, H).astype(f32), (2, 0, 1))   # (H, 4, H)
    w_hh_t_pad = jnp.zeros((GP, 4, GP), f32).at[:H, :, :H].set(w_hh_g)
    w_hh_t_pad = w_hh_t_pad.reshape(GP, 4 * GP)
    # Output head: (out, H) -> (GP, OUTP); padded rows zero so padded h lanes never leak.
    w_out_t_pad = jnp.zeros((GP, OUTP), f32).at[:H, :out_dim].set(w_out.T.astype(f32))
    b_out_pad = jnp.zeros((1, OUTP), f32).at[0, :out_dim].set(b_out.astype(f32))

    # x : (B, T) -> time-major (T, Bp): per-step reads become leading-axis reads.
    x_tb = jnp.zeros((seq_len, Bp), f32).at[:, :B].set(x.astype(f32).T)

    kernel = functools.partial(cnnlstm_kernel, gate_pad=GP, seq_len=seq_len)
    y_pad = pl.pallas_call(
        kernel,
        out_shape=jax.ShapeDtypeStruct((Bp, OUTP), f32),
        in_specs=[pl.BlockSpec(memory_space=pltpu.MemorySpace.VMEM)] * 6,
        out_specs=pl.BlockSpec(memory_space=pltpu.MemorySpace.VMEM),
    )(x_tb, w_ih_pad, w_hh_t_pad, b_pad, w_out_t_pad, b_out_pad)
    return y_pad[:B, :out_dim]


def cnnlstm_reference(x, params, *, hidden, seq_len, out_dim):
    """Pure-JAX reference mirroring torch.nn.LSTM + Linear + ReLU6."""
    w_ih, w_hh, b_ih, b_hh, w_out, b_out = params
    B = x.shape[0]

    def step(carry, x_t):
        h, c = carry
        gates = x_t[:, None] * w_ih[:, 0][None, :] + h @ w_hh.T + b_ih + b_hh
        i = jax.nn.sigmoid(gates[:, 0 * hidden:1 * hidden])
        f = jax.nn.sigmoid(gates[:, 1 * hidden:2 * hidden])
        g = jnp.tanh(gates[:, 2 * hidden:3 * hidden])
        o = jax.nn.sigmoid(gates[:, 3 * hidden:4 * hidden])
        c = f * c + i * g
        h = o * jnp.tanh(c)
        return (h, c), None

    h0 = jnp.zeros((B, hidden), jnp.float32)
    c0 = jnp.zeros((B, hidden), jnp.float32)
    (h_last, _), _ = lax.scan(step, (h0, c0), x.T)   # scan over time
    h_act = _relu6(h_last)
    return _relu6(h_act @ w_out.T + b_out)


if __name__ == "__main__":
    B, T, H, OUT = 4, 8, 32, 8          # batch, seq_len, n_hiddenLSTM, out_param

    key = jax.random.PRNGKey(0)
    kx, k1, k2, k3, k4, k5, k6 = jax.random.split(key, 7)

    # Deterministic synthetic parameters (torch.nn.LSTM / Linear shapes).
    scale = 1.0 / jnp.sqrt(H)
    w_ih = jax.random.uniform(k1, (4 * H, 1), jnp.float32, -scale, scale)
    w_hh = jax.random.uniform(k2, (4 * H, H), jnp.float32, -scale, scale)
    b_ih = jax.random.uniform(k3, (4 * H,), jnp.float32, -scale, scale)
    b_hh = jax.random.uniform(k4, (4 * H,), jnp.float32, -scale, scale)
    w_out = jax.random.uniform(k5, (OUT, H), jnp.float32, -scale, scale)
    b_out = jax.random.uniform(k6, (OUT,), jnp.float32, -scale, scale)
    params = (w_ih, w_hh, b_ih, b_hh, w_out, b_out)

    x = jax.random.normal(kx, (B, T), jnp.float32)

    y = cnnlstm_forward(x, params, hidden=H, seq_len=T, out_dim=OUT)
    y = jax.block_until_ready(y)

    y_ref = cnnlstm_reference(x, params, hidden=H, seq_len=T, out_dim=OUT)
    if not bool(jnp.allclose(y, y_ref, atol=1e-5, rtol=1e-5)):
        raise AssertionError("Pallas kernel mismatch vs JAX reference")

    print("KERNEL_OK")
</pallas_src>

<mosaic_0001>
module attributes {stable_mosaic.version = 11 : i64} {
  func.func @cnnlstm_kernel(%arg0: memref<8x8xf32, #tpu.memory_space<vmem>>, %arg1: memref<1x512xf32, #tpu.memory_space<vmem>>, %arg2: memref<128x512xf32, #tpu.memory_space<vmem>>, %arg3: memref<1x512xf32, #tpu.memory_space<vmem>>, %arg4: memref<128x128xf32, #tpu.memory_space<vmem>>, %arg5: memref<1x128xf32, #tpu.memory_space<vmem>>, %arg6: memref<8x128xf32, #tpu.memory_space<vmem>>) attributes {dimension_semantics = [], scalar_prefetch = 0 : i64, scratch_operands = 0 : i64, tpu.core_type = #tpu.core_type<tc>} {
    %c0 = arith.constant 0 : index
    %c0_0 = arith.constant 0 : index
    %0 = vector.load %arg0[%c0, %c0_0] : memref<8x8xf32, #tpu.memory_space<vmem>>, vector<8x8xf32>
    %c0_1 = arith.constant 0 : index
    %c0_2 = arith.constant 0 : index
    %1 = vector.load %arg1[%c0_1, %c0_2] : memref<1x512xf32, #tpu.memory_space<vmem>>, vector<1x512xf32>
    %c0_3 = arith.constant 0 : index
    %c0_4 = arith.constant 0 : index
    %2 = vector.load %arg2[%c0_3, %c0_4] : memref<128x512xf32, #tpu.memory_space<vmem>>, vector<128x512xf32>
    %c0_5 = arith.constant 0 : index
    %c0_6 = arith.constant 0 : index
    %3 = vector.load %arg3[%c0_5, %c0_6] : memref<1x512xf32, #tpu.memory_space<vmem>>, vector<1x512xf32>
    %4 = vector.shape_cast %0 : vector<8x8xf32> to vector<8x8x1xf32>
    %5 = vector.shape_cast %1 : vector<1x512xf32> to vector<1x1x512xf32>
    %6 = vector.broadcast %4 : vector<8x8x1xf32> to vector<8x8x512xf32>
    %7 = vector.broadcast %5 : vector<1x1x512xf32> to vector<8x8x512xf32>
    %8 = arith.mulf %6, %7 : vector<8x8x512xf32>
    %9 = vector.shape_cast %3 : vector<1x512xf32> to vector<1x1x512xf32>
    %10 = vector.broadcast %9 : vector<1x1x512xf32> to vector<8x8x512xf32>
    %11 = arith.addf %8, %10 : vector<8x8x512xf32>
    %cst = arith.constant 0.000000e+00 : f32
    %12 = vector.broadcast %cst : f32 to vector<8x128xf32>
    %cst_7 = arith.constant 0.000000e+00 : f32
    %13 = vector.broadcast %cst_7 : f32 to vector<8x128xf32>
    %14 = vector.extract_strided_slice %11 {offsets = [0, 0, 0], sizes = [1, 8, 512], strides = [1, 1, 1]} : vector<8x8x512xf32> to vector<1x8x512xf32>
    %15 = vector.shape_cast %14 : vector<1x8x512xf32> to vector<8x512xf32>
    %cst_8 = arith.constant dense<0.000000e+00> : vector<8x512xf32>
    %16 = tpu.matmul %12, %2, %cst_8 {dimension_numbers = #tpu.dot_dimension_numbers<[1], [0], [0], [1], [0, 0, 1, 1], [], []>} : vector<8x128xf32>, vector<128x512xf32>, vector<8x512xf32> -> vector<8x512xf32>
    %17 = arith.addf %15, %16 : vector<8x512xf32>
    %18 = vector.extract_strided_slice %17 {offsets = [0, 0], sizes = [8, 128], strides = [1, 1]} : vector<8x512xf32> to vector<8x128xf32>
    %19 = arith.negf %18 : vector<8x128xf32>
    %20 = math.exp %19 : vector<8x128xf32>
    %cst_9 = arith.constant 1.000000e+00 : f32
    %21 = vector.broadcast %cst_9 : f32 to vector<8x128xf32>
    %22 = arith.addf %21, %20 : vector<8x128xf32>
    %23 = arith.divf %21, %22 : vector<8x128xf32>
    %24 = vector.extract_strided_slice %17 {offsets = [0, 128], sizes = [8, 128], strides = [1, 1]} : vector<8x512xf32> to vector<8x128xf32>
    %25 = arith.negf %24 : vector<8x128xf32>
    %26 = math.exp %25 : vector<8x128xf32>
    %cst_10 = arith.constant 1.000000e+00 : f32
    %27 = vector.broadcast %cst_10 : f32 to vector<8x128xf32>
    %28 = arith.addf %27, %26 : vector<8x128xf32>
    %29 = arith.divf %27, %28 : vector<8x128xf32>
    %30 = vector.extract_strided_slice %17 {offsets = [0, 256], sizes = [8, 128], strides = [1, 1]} : vector<8x512xf32> to vector<8x128xf32>
    %31 = math.tanh %30 : vector<8x128xf32>
    %32 = vector.extract_strided_slice %17 {offsets = [0, 384], sizes = [8, 128], strides = [1, 1]} : vector<8x512xf32> to vector<8x128xf32>
    %33 = arith.negf %32 : vector<8x128xf32>
    %34 = math.exp %33 : vector<8x128xf32>
    %cst_11 = arith.constant 1.000000e+00 : f32
    %35 = vector.broadcast %cst_11 : f32 to vector<8x128xf32>
    %36 = arith.addf %35, %34 : vector<8x128xf32>
    %37 = arith.divf %35, %36 : vector<8x128xf32>
    %38 = arith.mulf %29, %13 : vector<8x128xf32>
    %39 = arith.mulf %23, %31 : vector<8x128xf32>
    %40 = arith.addf %38, %39 : vector<8x128xf32>
    %41 = math.tanh %40 : vector<8x128xf32>
    %42 = arith.mulf %37, %41 : vector<8x128xf32>
    %43 = vector.extract_strided_slice %11 {offsets = [1, 0, 0], sizes = [1, 8, 512], strides = [1, 1, 1]} : vector<8x8x512xf32> to vector<1x8x512xf32>
    %44 = vector.shape_cast %43 : vector<1x8x512xf32> to vector<8x512xf32>
    %cst_12 = arith.constant dense<0.000000e+00> : vector<8x512xf32>
    %45 = tpu.matmul %42, %2, %cst_12 {dimension_numbers = #tpu.dot_dimension_numbers<[1], [0], [0], [1], [0, 0, 1, 1], [], []>} : vector<8x128xf32>, vector<128x512xf32>, vector<8x512xf32> -> vector<8x512xf32>
    %46 = arith.addf %44, %45 : vector<8x512xf32>
    %47 = vector.extract_strided_slice %46 {offsets = [0, 0], sizes = [8, 128], strides = [1, 1]} : vector<8x512xf32> to vector<8x128xf32>
    %48 = arith.negf %47 : vector<8x128xf32>
    %49 = math.exp %48 : vector<8x128xf32>
    %cst_13 = arith.constant 1.000000e+00 : f32
    %50 = vector.broadcast %cst_13 : f32 to vector<8x128xf32>
    %51 = arith.addf %50, %49 : vector<8x128xf32>
    %52 = arith.divf %50, %51 : vector<8x128xf32>
    %53 = vector.extract_strided_slice %46 {offsets = [0, 128], sizes = [8, 128], strides = [1, 1]} : vector<8x512xf32> to vector<8x128xf32>
    %54 = arith.negf %53 : vector<8x128xf32>
    %55 = math.exp %54 : vector<8x128xf32>
    %cst_14 = arith.constant 1.000000e+00 : f32
    %56 = vector.broadcast %cst_14 : f32 to vector<8x128xf32>
    %57 = arith.addf %56, %55 : vector<8x128xf32>
    %58 = arith.divf %56, %57 : vector<8x128xf32>
    %59 = vector.extract_strided_slice %46 {offsets = [0, 256], sizes = [8, 128], strides = [1, 1]} : vector<8x512xf32> to vector<8x128xf32>
    %60 = math.tanh %59 : vector<8x128xf32>
    %61 = vector.extract_strided_slice %46 {offsets = [0, 384], sizes = [8, 128], strides = [1, 1]} : vector<8x512xf32> to vector<8x128xf32>
    %62 = arith.negf %61 : vector<8x128xf32>
    %63 = math.exp %62 : vector<8x128xf32>
    %cst_15 = arith.constant 1.000000e+00 : f32
    %64 = vector.broadcast %cst_15 : f32 to vector<8x128xf32>
    %65 = arith.addf %64, %63 : vector<8x128xf32>
    %66 = arith.divf %64, %65 : vector<8x128xf32>
    %67 = arith.mulf %58, %40 : vector<8x128xf32>
    %68 = arith.mulf %52, %60 : vector<8x128xf32>
    %69 = arith.addf %67, %68 : vector<8x128xf32>
    %70 = math.tanh %69 : vector<8x128xf32>
    %71 = arith.mulf %66, %70 : vector<8x128xf32>
    %72 = vector.extract_strided_slice %11 {offsets = [2, 0, 0], sizes = [1, 8, 512], strides = [1, 1, 1]} : vector<8x8x512xf32> to vector<1x8x512xf32>
    %73 = vector.shape_cast %72 : vector<1x8x512xf32> to vector<8x512xf32>
    %cst_16 = arith.constant dense<0.000000e+00> : vector<8x512xf32>
    %74 = tpu.matmul %71, %2, %cst_16 {dimension_numbers = #tpu.dot_dimension_numbers<[1], [0], [0], [1], [0, 0, 1, 1], [], []>} : vector<8x128xf32>, vector<128x512xf32>, vector<8x512xf32> -> vector<8x512xf32>
    %75 = arith.addf %73, %74 : vector<8x512xf32>
    %76 = vector.extract_strided_slice %75 {offsets = [0, 0], sizes = [8, 128], strides = [1, 1]} : vector<8x512xf32> to vector<8x128xf32>
    %77 = arith.negf %76 : vector<8x128xf32>
    %78 = math.exp %77 : vector<8x128xf32>
    %cst_17 = arith.constant 1.000000e+00 : f32
    %79 = vector.broadcast %cst_17 : f32 to vector<8x128xf32>
    %80 = arith.addf %79, %78 : vector<8x128xf32>
    %81 = arith.divf %79, %80 : vector<8x128xf32>
    %82 = vector.extract_strided_slice %75 {offsets = [0, 128], sizes = [8, 128], strides = [1, 1]} : vector<8x512xf32> to vector<8x128xf32>
    %83 = arith.negf %82 : vector<8x128xf32>
    %84 = math.exp %83 : vector<8x128xf32>
    %cst_18 = arith.constant 1.000000e+00 : f32
    %85 = vector.broadcast %cst_18 : f32 to vector<8x128xf32>
    %86 = arith.addf %85, %84 : vector<8x128xf32>
    %87 = arith.divf %85, %86 : vector<8x128xf32>
    %88 = vector.extract_strided_slice %75 {offsets = [0, 256], sizes = [8, 128], strides = [1, 1]} : vector<8x512xf32> to vector<8x128xf32>
    %89 = math.tanh %88 : vector<8x128xf32>
    %90 = vector.extract_strided_slice %75 {offsets = [0, 384], sizes = [8, 128], strides = [1, 1]} : vector<8x512xf32> to vector<8x128xf32>
    %91 = arith.negf %90 : vector<8x128xf32>
    %92 = math.exp %91 : vector<8x128xf32>
    %cst_19 = arith.constant 1.000000e+00 : f32
    %93 = vector.broadcast %cst_19 : f32 to vector<8x128xf32>
    %94 = arith.addf %93, %92 : vector<8x128xf32>
    %95 = arith.divf %93, %94 : vector<8x128xf32>
    %96 = arith.mulf %87, %69 : vector<8x128xf32>
    %97 = arith.mulf %81, %89 : vector<8x128xf32>
    %98 = arith.addf %96, %97 : vector<8x128xf32>
    %99 = math.tanh %98 : vector<8x128xf32>
    %100 = arith.mulf %95, %99 : vector<8x128xf32>
    %101 = vector.extract_strided_slice %11 {offsets = [3, 0, 0], sizes = [1, 8, 512], strides = [1, 1, 1]} : vector<8x8x512xf32> to vector<1x8x512xf32>
    %102 = vector.shape_cast %101 : vector<1x8x512xf32> to vector<8x512xf32>
    %cst_20 = arith.constant dense<0.000000e+00> : vector<8x512xf32>
    %103 = tpu.matmul %100, %2, %cst_20 {dimension_numbers = #tpu.dot_dimension_numbers<[1], [0], [0], [1], [0, 0, 1, 1], [], []>} : vector<8x128xf32>, vector<128x512xf32>, vector<8x512xf32> -> vector<8x512xf32>
    %104 = arith.addf %102, %103 : vector<8x512xf32>
    %105 = vector.extract_strided_slice %104 {offsets = [0, 0], sizes = [8, 128], strides = [1, 1]} : vector<8x512xf32> to vector<8x128xf32>
    %106 = arith.negf %105 : vector<8x128xf32>
    %107 = math.exp %106 : vector<8x128xf32>
    %cst_21 = arith.constant 1.000000e+00 : f32
    %108 = vector.broadcast %cst_21 : f32 to vector<8x128xf32>
    %109 = arith.addf %108, %107 : vector<8x128xf32>
    %110 = arith.divf %108, %109 : vector<8x128xf32>
    %111 = vector.extract_strided_slice %104 {offsets = [0, 128], sizes = [8, 128], strides = [1, 1]} : vector<8x512xf32> to vector<8x128xf32>
    %112 = arith.negf %111 : vector<8x128xf32>
    %113 = math.exp %112 : vector<8x128xf32>
    %cst_22 = arith.constant 1.000000e+00 : f32
    %114 = vector.broadcast %cst_22 : f32 to vector<8x128xf32>
    %115 = arith.addf %114, %113 : vector<8x128xf32>
    %116 = arith.divf %114, %115 : vector<8x128xf32>
    %117 = vector.extract_strided_slice %104 {offsets = [0, 256], sizes = [8, 128], strides = [1, 1]} : vector<8x512xf32> to vector<8x128xf32>
    %118 = math.tanh %117 : vector<8x128xf32>
    %119 = vector.extract_strided_slice %104 {offsets = [0, 384], sizes = [8, 128], strides = [1, 1]} : vector<8x512xf32> to vector<8x128xf32>
    %120 = arith.negf %119 : vector<8x128xf32>
    %121 = math.exp %120 : vector<8x128xf32>
    %cst_23 = arith.constant 1.000000e+00 : f32
    %122 = vector.broadcast %cst_23 : f32 to vector<8x128xf32>
    %123 = arith.addf %122, %121 : vector<8x128xf32>
    %124 = arith.divf %122, %123 : vector<8x128xf32>
    %125 = arith.mulf %116, %98 : vector<8x128xf32>
    %126 = arith.mulf %110, %118 : vector<8x128xf32>
    %127 = arith.addf %125, %126 : vector<8x128xf32>
    %128 = math.tanh %127 : vector<8x128xf32>
    %129 = arith.mulf %124, %128 : vector<8x128xf32>
    %130 = vector.extract_strided_slice %11 {offsets = [4, 0, 0], sizes = [1, 8, 512], strides = [1, 1, 1]} : vector<8x8x512xf32> to vector<1x8x512xf32>
    %131 = vector.shape_cast %130 : vector<1x8x512xf32> to vector<8x512xf32>
    %cst_24 = arith.constant dense<0.000000e+00> : vector<8x512xf32>
    %132 = tpu.matmul %129, %2, %cst_24 {dimension_numbers = #tpu.dot_dimension_numbers<[1], [0], [0], [1], [0, 0, 1, 1], [], []>} : vector<8x128xf32>, vector<128x512xf32>, vector<8x512xf32> -> vector<8x512xf32>
    %133 = arith.addf %131, %132 : vector<8x512xf32>
    %134 = vector.extract_strided_slice %133 {offsets = [0, 0], sizes = [8, 128], strides = [1, 1]} : vector<8x512xf32> to vector<8x128xf32>
    %135 = arith.negf %134 : vector<8x128xf32>
    %136 = math.exp %135 : vector<8x128xf32>
    %cst_25 = arith.constant 1.000000e+00 : f32
    %137 = vector.broadcast %cst_25 : f32 to vector<8x128xf32>
    %138 = arith.addf %137, %136 : vector<8x128xf32>
    %139 = arith.divf %137, %138 : vector<8x128xf32>
    %140 = vector.extract_strided_slice %133 {offsets = [0, 128], sizes = [8, 128], strides = [1, 1]} : vector<8x512xf32> to vector<8x128xf32>
    %141 = arith.negf %140 : vector<8x128xf32>
    %142 = math.exp %141 : vector<8x128xf32>
    %cst_26 = arith.constant 1.000000e+00 : f32
    %143 = vector.broadcast %cst_26 : f32 to vector<8x128xf32>
    %144 = arith.addf %143, %142 : vector<8x128xf32>
    %145 = arith.divf %143, %144 : vector<8x128xf32>
    %146 = vector.extract_strided_slice %133 {offsets = [0, 256], sizes = [8, 128], strides = [1, 1]} : vector<8x512xf32> to vector<8x128xf32>
    %147 = math.tanh %146 : vector<8x128xf32>
    %148 = vector.extract_strided_slice %133 {offsets = [0, 384], sizes = [8, 128], strides = [1, 1]} : vector<8x512xf32> to vector<8x128xf32>
    %149 = arith.negf %148 : vector<8x128xf32>
    %150 = math.exp %149 : vector<8x128xf32>
    %cst_27 = arith.constant 1.000000e+00 : f32
    %151 = vector.broadcast %cst_27 : f32 to vector<8x128xf32>
    %152 = arith.addf %151, %150 : vector<8x128xf32>
    %153 = arith.divf %151, %152 : vector<8x128xf32>
    %154 = arith.mulf %145, %127 : vector<8x128xf32>
    %155 = arith.mulf %139, %147 : vector<8x128xf32>
    %156 = arith.addf %154, %155 : vector<8x128xf32>
    %157 = math.tanh %156 : vector<8x128xf32>
    %158 = arith.mulf %153, %157 : vector<8x128xf32>
    %159 = vector.extract_strided_slice %11 {offsets = [5, 0, 0], sizes = [1, 8, 512], strides = [1, 1, 1]} : vector<8x8x512xf32> to vector<1x8x512xf32>
    %160 = vector.shape_cast %159 : vector<1x8x512xf32> to vector<8x512xf32>
    %cst_28 = arith.constant dense<0.000000e+00> : vector<8x512xf32>
    %161 = tpu.matmul %158, %2, %cst_28 {dimension_numbers = #tpu.dot_dimension_numbers<[1], [0], [0], [1], [0, 0, 1, 1], [], []>} : vector<8x128xf32>, vector<128x512xf32>, vector<8x512xf32> -> vector<8x512xf32>
    %162 = arith.addf %160, %161 : vector<8x512xf32>
    %163 = vector.extract_strided_slice %162 {offsets = [0, 0], sizes = [8, 128], strides = [1, 1]} : vector<8x512xf32> to vector<8x128xf32>
    %164 = arith.negf %163 : vector<8x128xf32>
    %165 = math.exp %164 : vector<8x128xf32>
    %cst_29 = arith.constant 1.000000e+00 : f32
    %166 = vector.broadcast %cst_29 : f32 to vector<8x128xf32>
    %167 = arith.addf %166, %165 : vector<8x128xf32>
    %168 = arith.divf %166, %167 : vector<8x128xf32>
    %169 = vector.extract_strided_slice %162 {offsets = [0, 128], sizes = [8, 128], strides = [1, 1]} : vector<8x512xf32> to vector<8x128xf32>
    %170 = arith.negf %169 : vector<8x128xf32>
    %171 = math.exp %170 : vector<8x128xf32>
    %cst_30 = arith.constant 1.000000e+00 : f32
    %172 = vector.broadcast %cst_30 : f32 to vector<8x128xf32>
    %173 = arith.addf %172, %171 : vector<8x128xf32>
    %174 = arith.divf %172, %173 : vector<8x128xf32>
    %175 = vector.extract_strided_slice %162 {offsets = [0, 256], sizes = [8, 128], strides = [1, 1]} : vector<8x512xf32> to vector<8x128xf32>
    %176 = math.tanh %175 : vector<8x128xf32>
    %177 = vector.extract_strided_slice %162 {offsets = [0, 384], sizes = [8, 128], strides = [1, 1]} : vector<8x512xf32> to vector<8x128xf32>
    %178 = arith.negf %177 : vector<8x128xf32>
    %179 = math.exp %178 : vector<8x128xf32>
    %cst_31 = arith.constant 1.000000e+00 : f32
    %180 = vector.broadcast %cst_31 : f32 to vector<8x128xf32>
    %181 = arith.addf %180, %179 : vector<8x128xf32>
    %182 = arith.divf %180, %181 : vector<8x128xf32>
    %183 = arith.mulf %174, %156 : vector<8x128xf32>
    %184 = arith.mulf %168, %176 : vector<8x128xf32>
    %185 = arith.addf %183, %184 : vector<8x128xf32>
    %186 = math.tanh %185 : vector<8x128xf32>
    %187 = arith.mulf %182, %186 : vector<8x128xf32>
    %188 = vector.extract_strided_slice %11 {offsets = [6, 0, 0], sizes = [1, 8, 512], strides = [1, 1, 1]} : vector<8x8x512xf32> to vector<1x8x512xf32>
    %189 = vector.shape_cast %188 : vector<1x8x512xf32> to vector<8x512xf32>
    %cst_32 = arith.constant dense<0.000000e+00> : vector<8x512xf32>
    %190 = tpu.matmul %187, %2, %cst_32 {dimension_numbers = #tpu.dot_dimension_numbers<[1], [0], [0], [1], [0, 0, 1, 1], [], []>} : vector<8x128xf32>, vector<128x512xf32>, vector<8x512xf32> -> vector<8x512xf32>
    %191 = arith.addf %189, %190 : vector<8x512xf32>
    %192 = vector.extract_strided_slice %191 {offsets = [0, 0], sizes = [8, 128], strides = [1, 1]} : vector<8x512xf32> to vector<8x128xf32>
    %193 = arith.negf %192 : vector<8x128xf32>
    %194 = math.exp %193 : vector<8x128xf32>
    %cst_33 = arith.constant 1.000000e+00 : f32
    %195 = vector.broadcast %cst_33 : f32 to vector<8x128xf32>
    %196 = arith.addf %195, %194 : vector<8x128xf32>
    %197 = arith.divf %195, %196 : vector<8x128xf32>
    %198 = vector.extract_strided_slice %191 {offsets = [0, 128], sizes = [8, 128], strides = [1, 1]} : vector<8x512xf32> to vector<8x128xf32>
    %199 = arith.negf %198 : vector<8x128xf32>
    %200 = math.exp %199 : vector<8x128xf32>
    %cst_34 = arith.constant 1.000000e+00 : f32
    %201 = vector.broadcast %cst_34 : f32 to vector<8x128xf32>
    %202 = arith.addf %201, %200 : vector<8x128xf32>
    %203 = arith.divf %201, %202 : vector<8x128xf32>
    %204 = vector.extract_strided_slice %191 {offsets = [0, 256], sizes = [8, 128], strides = [1, 1]} : vector<8x512xf32> to vector<8x128xf32>
    %205 = math.tanh %204 : vector<8x128xf32>
    %206 = vector.extract_strided_slice %191 {offsets = [0, 384], sizes = [8, 128], strides = [1, 1]} : vector<8x512xf32> to vector<8x128xf32>
    %207 = arith.negf %206 : vector<8x128xf32>
    %208 = math.exp %207 : vector<8x128xf32>
    %cst_35 = arith.constant 1.000000e+00 : f32
    %209 = vector.broadcast %cst_35 : f32 to vector<8x128xf32>
    %210 = arith.addf %209, %208 : vector<8x128xf32>
    %211 = arith.divf %209, %210 : vector<8x128xf32>
    %212 = arith.mulf %203, %185 : vector<8x128xf32>
    %213 = arith.mulf %197, %205 : vector<8x128xf32>
    %214 = arith.addf %212, %213 : vector<8x128xf32>
    %215 = math.tanh %214 : vector<8x128xf32>
    %216 = arith.mulf %211, %215 : vector<8x128xf32>
    %217 = vector.extract_strided_slice %11 {offsets = [7, 0, 0], sizes = [1, 8, 512], strides = [1, 1, 1]} : vector<8x8x512xf32> to vector<1x8x512xf32>
    %218 = vector.shape_cast %217 : vector<1x8x512xf32> to vector<8x512xf32>
    %cst_36 = arith.constant dense<0.000000e+00> : vector<8x512xf32>
    %219 = tpu.matmul %216, %2, %cst_36 {dimension_numbers = #tpu.dot_dimension_numbers<[1], [0], [0], [1], [0, 0, 1, 1], [], []>} : vector<8x128xf32>, vector<128x512xf32>, vector<8x512xf32> -> vector<8x512xf32>
    %220 = arith.addf %218, %219 : vector<8x512xf32>
    %221 = vector.extract_strided_slice %220 {offsets = [0, 0], sizes = [8, 128], strides = [1, 1]} : vector<8x512xf32> to vector<8x128xf32>
    %222 = arith.negf %221 : vector<8x128xf32>
    %223 = math.exp %222 : vector<8x128xf32>
    %cst_37 = arith.constant 1.000000e+00 : f32
    %224 = vector.broadcast %cst_37 : f32 to vector<8x128xf32>
    %225 = arith.addf %224, %223 : vector<8x128xf32>
    %226 = arith.divf %224, %225 : vector<8x128xf32>
    %227 = vector.extract_strided_slice %220 {offsets = [0, 128], sizes = [8, 128], strides = [1, 1]} : vector<8x512xf32> to vector<8x128xf32>
    %228 = arith.negf %227 : vector<8x128xf32>
    %229 = math.exp %228 : vector<8x128xf32>
    %cst_38 = arith.constant 1.000000e+00 : f32
    %230 = vector.broadcast %cst_38 : f32 to vector<8x128xf32>
    %231 = arith.addf %230, %229 : vector<8x128xf32>
    %232 = arith.divf %230, %231 : vector<8x128xf32>
    %233 = vector.extract_strided_slice %220 {offsets = [0, 256], sizes = [8, 128], strides = [1, 1]} : vector<8x512xf32> to vector<8x128xf32>
    %234 = math.tanh %233 : vector<8x128xf32>
    %235 = vector.extract_strided_slice %220 {offsets = [0, 384], sizes = [8, 128], strides = [1, 1]} : vector<8x512xf32> to vector<8x128xf32>
    %236 = arith.negf %235 : vector<8x128xf32>
    %237 = math.exp %236 : vector<8x128xf32>
    %cst_39 = arith.constant 1.000000e+00 : f32
    %238 = vector.broadcast %cst_39 : f32 to vector<8x128xf32>
    %239 = arith.addf %238, %237 : vector<8x128xf32>
    %240 = arith.divf %238, %239 : vector<8x128xf32>
    %241 = arith.mulf %232, %214 : vector<8x128xf32>
    %242 = arith.mulf %226, %234 : vector<8x128xf32>
    %243 = arith.addf %241, %242 : vector<8x128xf32>
    %244 = math.tanh %243 : vector<8x128xf32>
    %245 = arith.mulf %240, %244 : vector<8x128xf32>
    %cst_40 = arith.constant 0.000000e+00 : f32
    %cst_41 = arith.constant 6.000000e+00 : f32
    %246 = vector.broadcast %cst_40 : f32 to vector<8x128xf32>
    %247 = arith.maximumf %246, %245 : vector<8x128xf32>
    %248 = vector.broadcast %cst_41 : f32 to vector<8x128xf32>
    %249 = arith.minimumf %248, %247 : vector<8x128xf32>
    %c0_42 = arith.constant 0 : index
    %c0_43 = arith.constant 0 : index
    %250 = vector.load %arg4[%c0_42, %c0_43] : memref<128x128xf32, #tpu.memory_space<vmem>>, vector<128x128xf32>
    %cst_44 = arith.constant dense<0.000000e+00> : vector<8x128xf32>
    %251 = tpu.matmul %249, %250, %cst_44 {dimension_numbers = #tpu.dot_dimension_numbers<[1], [0], [0], [1], [0, 0, 1, 1], [], []>} : vector<8x128xf32>, vector<128x128xf32>, vector<8x128xf32> -> vector<8x128xf32>
    %c0_45 = arith.constant 0 : index
    %c0_46 = arith.constant 0 : index
    %252 = vector.load %arg5[%c0_45, %c0_46] : memref<1x128xf32, #tpu.memory_space<vmem>>, vector<1x128xf32>
    %253 = vector.broadcast %252 : vector<1x128xf32> to vector<8x128xf32>
    %254 = arith.addf %251, %253 : vector<8x128xf32>
    %cst_47 = arith.constant 0.000000e+00 : f32
    %cst_48 = arith.constant 6.000000e+00 : f32
    %255 = vector.broadcast %cst_47 : f32 to vector<8x128xf32>
    %256 = arith.maximumf %255, %254 : vector<8x128xf32>
    %257 = vector.broadcast %cst_48 : f32 to vector<8x128xf32>
    %258 = arith.minimumf %257, %256 : vector<8x128xf32>
    %c0_49 = arith.constant 0 : index
    %c0_50 = arith.constant 0 : index
    %259 = vector.load %arg6[%c0_49, %c0_50] : memref<8x128xf32, #tpu.memory_space<vmem>>, vector<8x128xf32>
    tpu.vector_store %arg6[%c0_49, %c0_50], %258 {strides = array<i32>} : memref<8x128xf32, #tpu.memory_space<vmem>>, vector<8x128xf32>,
    return
  }
}

</mosaic_0001>

<bundles_post_ra>
// kernel: tpu_custom_call.1
= control target key start
LH: loop header
LB: loop body
LE: loop exit
PB: predicated region body
PF: predicated region fallthrough
CT: control target
= control target key end

     0   :  { %11 = vsyncpa [#allocation3], 0  ;;  %s3245_s0 = inlined_call_operand.hbm [shape: f32[8,8], index: 0, kind: input, shape index: {}]   ;;  %s3246_s1 = inlined_call_operand.hbm [shape: f32[1,512], index: 1, kind: input, shape index: {}]   ;;  %s3247_s2 = inlined_call_operand.hbm [shape: f32[128,512], index: 2, kind: input, shape index: {}]   ;;  %s3248_s3 = inlined_call_operand.vmem [shape: f32[1,512], index: 3, kind: input, shape index: {}]   ;;  %s3249_s4 = inlined_call_operand.hbm [shape: f32[128,128], index: 4, kind: input, shape index: {}]   ;;  %s3250_s5 = inlined_call_operand.vmem [shape: f32[1,128], index: 5, kind: input, shape index: {}]   ;;  %s3251_s6 = inlined_call_operand.hbm [shape: f32[8,128], index: 6, kind: output, shape index: {}]  }
   0x1   :  { %12 = vsyncpa [#allocation6], 0 }
   0x2   :  { %13 = vsyncpa [#allocation9], 0 }
   0x3   :  { %14 = vsyncpa [#allocation4], 0  ;;  %s2651_s21 = smov [#allocation5]   ;;  %s2652_s23 = smov [#allocation2]  }
   0x4   :  { %s31_s22 = sshll.u32 %s2651_s21, 4  ;;  %s21_s24 = sshll.u32 %s2652_s23, 4  ;;  %s32_s22 = int_to_ptr.vmem [resolvable:$true] %s31_s22  ;;  %s22_s24 = int_to_ptr.vmem [resolvable:$true] %s21_s24 }
   0x5   :  { %s2533_s27 = scalar_lea.hbm %s3246_s1, 64 }
   0x6   :  { %p2534_p0 = scmp.ne.s32.totalorder %s3246_s1, %s2533_s27  ;;  %p2537_p1 = scmp.lt.u32.totalorder %s2533_s27, %s3246_s1 }
   0x8   :  { %p2539_p2 = pnand %p2537_p1, %p2534_p0 }
   0xa   :  { %2542 = shalt.err (!%p2539_p2)
}
   0xb   :  { %s2543_s8 = scalar_lea.vmem %s32_s22, 64  ;;  %p2548_p4 = scmp.lt.s32.totalorder %s32_s22, %s32_s22 }
   0xc   :  { %p2544_p3 = scmp.ne.s32.totalorder %s32_s22, %s2543_s8  ;;  %p2549_p5 = scmp.lt.s32.totalorder %s2543_s8, %s2543_s8 }
   0xe   :  { %p2550_p6 = por %p2549_p5, %p2548_p4 }
  0x10   :  { %p2551_p7 = pnand %p2550_p6, %p2544_p3 }
  0x12   :  { %2554 = shalt.err (!%p2551_p7)
}
  0x13   :  { %34 = dma.hbm_to_vmem [thread:$0]  %s3246_s1, 64, %s32_s22, [#allocation6]  }
  0x14   :  { %s2555_s13 = scalar_lea.hbm %s3245_s0, 128 }
  0x15   :  { %p2556_p8 = scmp.ne.s32.totalorder %s3245_s0, %s2555_s13  ;;  %p2559_p9 = scmp.lt.u32.totalorder %s2555_s13, %s3245_s0 }
  0x17   :  { %p2561_p10 = pnand %p2559_p9, %p2556_p8 }
  0x19   :  { %2564 = shalt.err (!%p2561_p10)
}
  0x1a   :  { %s2565_s18 = scalar_lea.vmem %s22_s24, 128  ;;  %p2570_p12 = scmp.lt.s32.totalorder %s22_s24, %s22_s24 }
  0x1b   :  { %p2566_p11 = scmp.ne.s32.totalorder %s22_s24, %s2565_s18  ;;  %p2571_p13 = scmp.lt.s32.totalorder %s2565_s18, %s2565_s18 }
  0x1d   :  { %p2572_p0 = por %p2571_p13, %p2570_p12 }
  0x1f   :  { %p2573_p1 = pnand %p2572_p0, %p2566_p11 }
  0x21   :  { %2576 = shalt.err (!%p2573_p1)
}
  0x22   :  { %24 = dma.hbm_to_vmem [thread:$0]  %s3245_s0, 128, %s22_s24, [#allocation3]  }
  0x23   :  { %s2653_s20 = smov [#allocation7]   ;;  %s2577_s25 = scalar_lea.hbm %s3247_s2, 8192 }
  0x24   :  { %s40_s21 = sshll.u32 %s2653_s20, 4  ;;  %p2578_p2 = scmp.ne.s32.totalorder %s3247_s2, %s2577_s25  ;;  %s41_s21 = int_to_ptr.vmem [resolvable:$true] %s40_s21 }
  0x25   :  { %p2581_p3 = scmp.lt.u32.totalorder %s2577_s25, %s3247_s2 }
  0x27   :  { %p2583_p4 = pnand %p2581_p3, %p2578_p2 }
  0x29   :  { %2586 = shalt.err (!%p2583_p4)
}
  0x2a   :  { %s2587_s30 = scalar_lea.vmem %s41_s21, 8192  ;;  %p2592_p6 = scmp.lt.s32.totalorder %s41_s21, %s41_s21 }
  0x2b   :  { %p2588_p5 = scmp.ne.s32.totalorder %s41_s21, %s2587_s30  ;;  %p2593_p7 = scmp.lt.s32.totalorder %s2587_s30, %s2587_s30 }
  0x2d   :  { %p2594_p8 = por %p2593_p7, %p2592_p6 }
  0x2f   :  { %p2595_p9 = pnand %p2594_p8, %p2588_p5 }
  0x31   :  { %2598 = shalt.err (!%p2595_p9)
}
  0x32   :  { %s2654_s0 = smov 512   ;;  %s2655_s24 = smov 32  }
  0x33   :  { %46 = dma.hbm_to_vmem [thread:$0]  %s3247_s2, 8192, %s41_s21, [#allocation6], %s2654_s0, %s2654_s0, %s2655_s24  }
  0x34   :  { %s2656_s9 = smov [#allocation8]   ;;  %s2599_s13 = scalar_lea.hbm %s3249_s4, 2048 }
  0x35   :  { %s54_s10 = sshll.u32 %s2656_s9, 4  ;;  %p2600_p10 = scmp.ne.s32.totalorder %s3249_s4, %s2599_s13  ;;  %s55_s10 = int_to_ptr.vmem [resolvable:$true] %s54_s10 }
  0x36   :  { %p2603_p11 = scmp.lt.u32.totalorder %s2599_s13, %s3249_s4 }
  0x38   :  { %p2605_p12 = pnand %p2603_p11, %p2600_p10 }
  0x3a   :  { %2608 = shalt.err (!%p2605_p12)
}
  0x3b   :  { %s2609_s18 = scalar_lea.vmem %s55_s10, 2048  ;;  %p2614_p0 = scmp.lt.s32.totalorder %s55_s10, %s55_s10 }
  0x3c   :  { %p2610_p13 = scmp.ne.s32.totalorder %s55_s10, %s2609_s18  ;;  %p2615_p1 = scmp.lt.s32.totalorder %s2609_s18, %s2609_s18 }
  0x3e   :  { %p2616_p2 = por %p2615_p1, %p2614_p0 }
  0x40   :  { %p2617_p3 = pnand %p2616_p2, %p2610_p13 }
  0x42   :  { %2620 = shalt.err (!%p2617_p3)
}
  0x43   :  { %s2657_s2 = smov 128   ;;  %s2658_s1 = smov 8  }
  0x44   :  { %60 = dma.hbm_to_vmem [thread:$0]  %s3249_s4, 2048, %s55_s10, [#allocation9], %s2657_s2, %s2657_s2, %s2658_s1  }
  0x45   :  { %2643 = dma.done.wait [#allocation3], 128  }
  0x46   :  { %2644 = vsyncadd [#allocation3], 4294967168 }
  0x47   :  { %2645 = dma.done.wait [#allocation6], 8256  }
  0x48   :  { %2646 = vsyncadd [#allocation6], 4294959040 }
  0x49   :  { %2647 = dma.done.wait [#allocation9], 2048  }
  0x4a   :  { %2648 = vsyncadd [#allocation9], 4294965248  ;;  %v3252_v0 = vmov 0.0   ;;  %v78_v1 = vld [vmem:[#allocation7 + $0x8] sm:$0xff]  ;;  %v80_v3 = vld [vmem:[#allocation7 + $0x18] sm:$0xff]  ;;  %v142_v48 = vlaneseq  ;;  %vm2661_vm0 = vmmov 0  }
  0x4b   :  { %368 = vmatprep.mubr.f32.mxu0 %v3252_v0  ;;  %439 = vmatprep.mubr.f32.mxu1 %v3252_v0  ;;  %v82_v2 = vld [vmem:[#allocation7 + $0x28] sm:$0xff]  ;;  %v84_v5 = vld [vmem:[#allocation7 + $0x38] sm:$0xff]  ;;  %v77_v6 = vld [vmem:[#allocation7] sm:$0xff]  ;;  %s2662_s23 = smov [#allocation10]  }
  0x4c   :  { %v2748_v4 = vpack.c.bf16 %v82_v2, %v78_v1  ;;  %v81_v7 = vld [vmem:[#allocation7 + $0x20] sm:$0xff]  ;;  %v2750_v8 = vpack.c.bf16 %v84_v5, %v80_v3  ;;  %v79_v10 = vld [vmem:[#allocation7 + $0x10] sm:$0xff]  ;;  %v86_v12 = vld [vmem:[#allocation7 + $0x48] sm:$0xff]  ;;  %v2798_v62 = vshrl.u32 %v142_v48, 7  ;;  %s1768_s25 = sshll.u32 %s2662_s23, 4  ;;  %s1769_s25 = int_to_ptr.vmem [resolvable:$true] %s1768_s25 }
  0x4d   :  { %v2752_v9 = vpack.c.bf16 %v81_v7, %v77_v6  ;;  %v83_v11 = vld [vmem:[#allocation7 + $0x30] sm:$0xff]  ;;  %v90_v14 = vld [vmem:[#allocation7 + $0x68] sm:$0xff]  ;;  %v88_v15 = vld [vmem:[#allocation7 + $0x58] sm:$0xff]  ;;  %s2621_s26 = scalar_lea.vmem %s1769_s25, 128  ;;  %p2626_p5 = scmp.lt.s32.totalorder %s1769_s25, %s1769_s25 }
  0x4e   :  { %1857 = vmatprep.subr.bf16.mxu0 %v2748_v4  ;;  %v2755_v13 = vpack.c.bf16 %v83_v11, %v79_v10  ;;  %v92_v16 = vld [vmem:[#allocation7 + $0x78] sm:$0xff]  ;;  %1889 = vmatprep.subr.bf16.mxu1 %v2750_v8  ;;  %v2759_v17 = vpack.c.bf16 %v90_v14, %v86_v12  ;;  %v85_v19 = vld [vmem:[#allocation7 + $0x40] sm:$0xff]  ;;  %v87_v21 = vld [vmem:[#allocation7 + $0x50] sm:$0xff]  ;;  %3258 = vst [vmem:[#allocation15_spill] sm:$0xff] %v2798_v62  ;;  %p2622_p4 = scmp.ne.s32.totalorder %s1769_s25, %s2621_s26  ;;  %p2627_p6 = scmp.lt.s32.totalorder %s2621_s26, %s2621_s26 }
  0x4f   :  { %1859 = vmatpush1.bf16.msra.mxu0 %v2752_v9  ;;  %v2761_v18 = vpack.c.bf16 %v92_v16, %v88_v15  ;;  %v89_v20 = vld [vmem:[#allocation7 + $0x60] sm:$0xff]  ;;  %v91_v23 = vld [vmem:[#allocation7 + $0x70] sm:$0xff]  ;;  %v94_v24 = vld [vmem:[#allocation7 + $0x88] sm:$0xff]  ;;  %v2813_v16 = vsub.s32 0, %v2798_v62 }
  0x50   :  { %1891 = vmatpush1.bf16.msra.mxu1 %v2755_v13  ;;  %v2764_v22 = vpack.c.bf16 %v89_v20, %v85_v19  ;;  %v98_v25 = vld [vmem:[#allocation7 + $0xa8] sm:$0xff]  ;;  %1861 = vmatprep.subr.bf16.mxu0 %v2759_v17  ;;  %v2768_v26 = vpack.c.bf16 %v91_v23, %v87_v21  ;;  %v96_v28 = vld [vmem:[#allocation7 + $0x98] sm:$0xff]  ;;  %v93_v30 = vld [vmem:[#allocation7 + $0x80] sm:$0xff]  ;;  %p2628_p7 = por %p2627_p6, %p2626_p5 }
  0x51   :  { %1893 = vmatprep.subr.bf16.mxu1 %v2761_v18  ;;  %v2770_v27 = vpack.c.bf16 %v98_v25, %v94_v24  ;;  %v100_v29 = vld [vmem:[#allocation7 + $0xb8] sm:$0xff]  ;;  %v97_v32 = vld [vmem:[#allocation7 + $0xa0] sm:$0xff]  ;;  %v95_v33 = vld [vmem:[#allocation7 + $0x90] sm:$0xff] }
  0x52   :  { %v2772_v31 = vpack.c.bf16 %v100_v29, %v96_v28  ;;  %v99_v34 = vld [vmem:[#allocation7 + $0xb0] sm:$0xff]  ;;  %v2775_v35 = vpack.c.bf16 %v97_v32, %v93_v30  ;;  %v102_v36 = vld [vmem:[#allocation7 + $0xc8] sm:$0xff]  ;;  %v104_v38 = vld [vmem:[#allocation7 + $0xd8] sm:$0xff]  ;;  %p2629_p8 = pnand %p2628_p7, %p2622_p4 }
  0x53   :  { %1863 = vmatpush1.bf16.msra.mxu0 %v2764_v22  ;;  %v106_v37 = vld [vmem:[#allocation7 + $0xe8] sm:$0xff]  ;;  %v2779_v39 = vpack.c.bf16 %v99_v34, %v95_v33  ;;  %v108_v41 = vld [vmem:[#allocation7 + $0xf8] sm:$0xff]  ;;  %v101_v42 = vld [vmem:[#allocation7 + $0xc0] sm:$0xff] }
  0x54   :  { %1895 = vmatpush1.bf16.msra.mxu1 %v2768_v26  ;;  %1865 = vmatprep.subr.bf16.mxu0 %v2770_v27  ;;  %v2781_v40 = vpack.c.bf16 %v106_v37, %v102_v36  ;;  %v105_v43 = vld [vmem:[#allocation7 + $0xe0] sm:$0xff]  ;;  %v2784_v44 = vpack.c.bf16 %v108_v41, %v104_v38  ;;  %v103_v45 = vld [vmem:[#allocation7 + $0xd0] sm:$0xff]  ;;  %v110_v47 = vld [vmem:[#allocation7 + $0x108] sm:$0xff] }
  0x55   :  { %1897 = vmatprep.subr.bf16.mxu1 %v2772_v31  ;;  %v107_v46 = vld [vmem:[#allocation7 + $0xf0] sm:$0xff]  ;;  %v114_v49 = vld [vmem:[#allocation7 + $0x128] sm:$0xff]  ;;  %v112_v50 = vld [vmem:[#allocation7 + $0x118] sm:$0xff]  ;;  %v2787_v52 = vpack.c.bf16 %v105_v43, %v101_v42 }
  0x56   :  { %v116_v51 = vld [vmem:[#allocation7 + $0x138] sm:$0xff]  ;;  %v2791_v53 = vpack.c.bf16 %v107_v46, %v103_v45  ;;  %v2793_v54 = vpack.c.bf16 %v114_v49, %v110_v47  ;;  %v109_v55 = vld [vmem:[#allocation7 + $0x100] sm:$0xff]  ;;  %v111_v57 = vld [vmem:[#allocation7 + $0x110] sm:$0xff] }
  0x57   :  { %1867 = vmatpush1.bf16.msra.mxu0 %v2775_v35  ;;  %v113_v56 = vld [vmem:[#allocation7 + $0x120] sm:$0xff]  ;;  %v2796_v58 = vpack.c.bf16 %v116_v51, %v112_v50  ;;  %v115_v59 = vld [vmem:[#allocation7 + $0x130] sm:$0xff]  ;;  %v118_v60 = vld [vmem:[#allocation7 + $0x148] sm:$0xff] }
  0x58   :  { %1899 = vmatpush1.bf16.msra.mxu1 %v2779_v39  ;;  %1869 = vmatprep.subr.bf16.mxu0 %v2781_v40  ;;  %v122_v61 = vld [vmem:[#allocation7 + $0x168] sm:$0xff]  ;;  %v120_v63 = vld [vmem:[#allocation7 + $0x158] sm:$0xff]  ;;  %v2801_v2 = vpack.c.bf16 %v113_v56, %v109_v55  ;;  %v2805_v3 = vpack.c.bf16 %v115_v59, %v111_v57  ;;  %v117_v6 = vld [vmem:[#allocation7 + $0x140] sm:$0xff]  ;;  %v151_v56 = vsub.s32 1, %v2798_v62 }
  0x59   :  { %1901 = vmatprep.subr.bf16.mxu1 %v2784_v44  ;;  %v124_v1 = vld [vmem:[#allocation7 + $0x178] sm:$0xff]  ;;  %v2807_v5 = vpack.c.bf16 %v122_v61, %v118_v60  ;;  %v121_v7 = vld [vmem:[#allocation7 + $0x160] sm:$0xff]  ;;  %v119_v10 = vld [vmem:[#allocation7 + $0x150] sm:$0xff] }
  0x5a   :  { %v2810_v11 = vpack.c.bf16 %v124_v1, %v120_v63  ;;  %v123_v12 = vld [vmem:[#allocation7 + $0x170] sm:$0xff]  ;;  %v126_v14 = vld [vmem:[#allocation7 + $0x188] sm:$0xff]  ;;  %v128_v19 = vld [vmem:[#allocation7 + $0x198] sm:$0xff]  ;;  %v2816_v21 = vpack.c.bf16 %v121_v7, %v117_v6  ;;  %v2902_v6 = vsub.s32 3, %v2798_v62 }
  0x5b   :  { %1871 = vmatpush1.bf16.msra.mxu0 %v2787_v52  ;;  %v130_v15 = vld [vmem:[#allocation7 + $0x1a8] sm:$0xff]  ;;  %v132_v20 = vld [vmem:[#allocation7 + $0x1b8] sm:$0xff]  ;;  %v125_v23 = vld [vmem:[#allocation7 + $0x180] sm:$0xff]  ;;  %v2820_v24 = vpack.c.bf16 %v123_v12, %v119_v10 }
  0x5c   :  { %1903 = vmatpush1.bf16.msra.mxu1 %v2791_v53  ;;  %1873 = vmatprep.subr.bf16.mxu0 %v2793_v54  ;;  %v2822_v25 = vpack.c.bf16 %v130_v15, %v126_v14  ;;  %v129_v28 = vld [vmem:[#allocation7 + $0x1a0] sm:$0xff]  ;;  %v127_v29 = vld [vmem:[#allocation7 + $0x190] sm:$0xff]  ;;  %v2827_v32 = vpack.c.bf16 %v132_v20, %v128_v19  ;;  %v134_v34 = vld [vmem:[#allocation7 + $0x1c8] sm:$0xff]  ;;  %v2915_v19 = vsub.s32 2, %v2798_v62 }
  0x5d   :  { %1905 = vmatprep.subr.bf16.mxu1 %v2796_v58  ;;  %v2824_v30 = vld [vmem:[#allocation2] sm:$0xff]  ;;  %v138_v36 = vld [vmem:[#allocation7 + $0x1e8] sm:$0xff]  ;;  %v2832_v42 = vpack.c.bf16 %v129_v28, %v125_v23  ;;  %v133_v46 = vld [vmem:[#allocation7 + $0x1c0] sm:$0xff] }
  0x5e   :  { %v131_v33 = vld [vmem:[#allocation7 + $0x1b0] sm:$0xff]  ;;  %v145_v37 = vrot.slane %v2824_v30, %v2813_v16  ;;  %v136_v38 = vld [vmem:[#allocation7 + $0x1d8] sm:$0xff]  ;;  %v2838_v45 = vpack.c.bf16 %v138_v36, %v134_v34  ;;  %v137_v47 = vld [vmem:[#allocation7 + $0x1e0] sm:$0xff]  ;;  %v152_v57 = vrot.slane %v2824_v30, %v151_v56 }
  0x5f   :  { %1875 = vmatpush1.bf16.msra.mxu0 %v2801_v2  ;;  %v140_v41 = vld [vmem:[#allocation7 + $0x1f8] sm:$0xff]  ;;  %v2836_v43 = vpack.c.bf16 %v131_v33, %v127_v29  ;;  %v135_v49 = vld [vmem:[#allocation7 + $0x1d0] sm:$0xff]  ;;  %v2844_v51 = vpack.c.bf16 %v137_v47, %v133_v46 }
  0x60   :  { %1907 = vmatpush1.bf16.msra.mxu1 %v2805_v3  ;;  %1877 = vmatprep.subr.bf16.mxu0 %v2807_v5  ;;  %v2841_v48 = vpack.c.bf16 %v140_v41, %v136_v38  ;;  %v139_v50 = vld [vmem:[#allocation7 + $0x1f0] sm:$0xff]  ;;  %v76_v59 = vld [vmem:[#allocation5] sm:$0xf] }
  0x61   :  { %1909 = vmatprep.subr.bf16.mxu1 %v2810_v11  ;;  %147 = vbcast.lane.b32.xlu0 %v145_v37, 256  ;;  %v2848_v55 = vpack.c.bf16 %v139_v50, %v135_v49  ;;  %v2894_v60 = vrot.slane %v76_v59, %v2813_v16  ;;  %v141_v61 = vld [vmem:[%s3248_s3] sm:$0xf]  ;;  %v2899_v63 = vrot.slane %v76_v59, %v151_v56 }
  0x62   :  { %v2905_v7 = vrot.slane %v141_v61, %v2813_v16  ;;  %v2908_v12 = vrot.slane %v141_v61, %v151_v56  ;;  %v2912_v15 = vrot.slane %v76_v59, %v2902_v6  ;;  %v2920_v28 = vrot.slane %v141_v61, %v2902_v6 }
  0x63   :  { %1879 = vmatpush1.bf16.msra.mxu0 %v2816_v21  ;;  %v2924_v33 = vrot.slane %v76_v59, %v2915_v19  ;;  %v2928_v50 = vrot.slane %v141_v61, %v2915_v19 }
  0x64   :  { %1911 = vmatpush1.bf16.msra.mxu1 %v2820_v24  ;;  %1881 = vmatprep.subr.bf16.mxu0 %v2822_v25  ;;  %3259 = vst [vmem:[#allocation16_spill] sm:$0xff] %v2912_v15 }
  0x65   :  { %1913 = vmatprep.subr.bf16.mxu1 %v2827_v32  ;;  %154 = vbcast.lane.b32.xlu0 %v152_v57, 256 }
  0x67   :  { %1883 = vmatpush1.bf16.msra.mxu0 %v2832_v42 }
  0x68   :  { %1915 = vmatpush1.bf16.msra.mxu1 %v2836_v43  ;;  %1885 = vmatprep.subr.bf16.mxu0 %v2838_v45 }
  0x69   :  { %1917 = vmatprep.subr.bf16.mxu1 %v2841_v48 }
  0x6b   :  { %1887 = vmatpush1.bf16.msra.mxu0 %v2844_v51 }
  0x6c   :  { %1919 = vmatpush1.bf16.msra.mxu1 %v2848_v55  ;;  %1921 = vmatprep.subr.bf16.mxu0 %v2748_v4 }
  0x6d   :  { %1953 = vmatprep.subr.bf16.mxu1 %v2750_v8 }
  0x6e   :  { %369 = vmatmul.mubr.f32.vlgmr.msra.gmra.mrb[0].mxu0 %v3252_v0 }
  0x6f   :  { %440 = vmatmul.mubr.f32.vlgmr.msra.gmra.mrb[0].mxu1 %v3252_v0  ;;  %1923 = vmatpush1.bf16.msra.mxu0 %v2752_v9 }
  0x70   :  { %1955 = vmatpush1.bf16.msra.mxu1 %v2755_v13  ;;  %1925 = vmatprep.subr.bf16.mxu0 %v2759_v17 }
  0x71   :  { %1957 = vmatprep.subr.bf16.mxu1 %v2761_v18  ;;  %538 = vmatprep.mubr.f32.mxu0 %v3252_v0 }
  0x72   :  { %609 = vmatprep.mubr.f32.mxu1 %v3252_v0 }
  0x73   :  { %1927 = vmatpush1.bf16.msra.mxu0 %v2764_v22 }
  0x74   :  { %1959 = vmatpush1.bf16.msra.mxu1 %v2768_v26  ;;  %1929 = vmatprep.subr.bf16.mxu0 %v2770_v27 }
  0x75   :  { %1961 = vmatprep.subr.bf16.mxu1 %v2772_v31 }
  0x77   :  { %1931 = vmatpush1.bf16.msra.mxu0 %v2775_v35 }
  0x78   :  { %1963 = vmatpush1.bf16.msra.mxu1 %v2779_v39  ;;  %1933 = vmatprep.subr.bf16.mxu0 %v2781_v40 }
  0x79   :  { %1965 = vmatprep.subr.bf16.mxu1 %v2784_v44 }
  0x7b   :  { %1935 = vmatpush1.bf16.msra.mxu0 %v2787_v52 }
  0x7c   :  { %1967 = vmatpush1.bf16.msra.mxu1 %v2791_v53  ;;  %1937 = vmatprep.subr.bf16.mxu0 %v2793_v54 }
  0x7d   :  { %1969 = vmatprep.subr.bf16.mxu1 %v2796_v58 }
  0x7f   :  { %1939 = vmatpush1.bf16.msra.mxu0 %v2801_v2 }
  0x80   :  { %1971 = vmatpush1.bf16.msra.mxu1 %v2805_v3  ;;  %1941 = vmatprep.subr.bf16.mxu0 %v2807_v5 }
  0x81   :  { %1973 = vmatprep.subr.bf16.mxu1 %v2810_v11 }
  0x83   :  { %1943 = vmatpush1.bf16.msra.mxu0 %v2816_v21 }
  0x84   :  { %1975 = vmatpush1.bf16.msra.mxu1 %v2820_v24  ;;  %1945 = vmatprep.subr.bf16.mxu0 %v2822_v25 }
  0x85   :  { %1977 = vmatprep.subr.bf16.mxu1 %v2827_v32 }
  0x87   :  { %1947 = vmatpush1.bf16.msra.mxu0 %v2832_v42 }
  0x88   :  { %1979 = vmatpush1.bf16.msra.mxu1 %v2836_v43  ;;  %1949 = vmatprep.subr.bf16.mxu0 %v2838_v45 }
  0x89   :  { %1981 = vmatprep.subr.bf16.mxu1 %v2841_v48 }
  0x8b   :  { %1951 = vmatpush1.bf16.msra.mxu0 %v2844_v51 }
  0x8c   :  { %1983 = vmatpush1.bf16.msra.mxu1 %v2848_v55  ;;  %1985 = vmatprep.subr.bf16.mxu0 %v2748_v4 }
  0x8d   :  { %2017 = vmatprep.subr.bf16.mxu1 %v2750_v8 }
  0xd3   :  { %v148_v1 = vpop.permute.xlu0 %147 }
  0xd4   :  { %v219_v10 = vmul.f32 %v2894_v60, %v148_v1  ;;  %v220_v14 = vmul.f32 %v2899_v63, %v148_v1  ;;  %v222_v29 = vmul.f32 %v2912_v15, %v148_v1  ;;  %v221_v56 = vmul.f32 %v2924_v33, %v148_v1 }
  0xd6   :  { %v272_v20 = vadd.f32 %v2905_v7, %v219_v10  ;;  %v273_v23 = vadd.f32 %v2908_v12, %v220_v14  ;;  %v275_v49 = vadd.f32 %v2920_v28, %v222_v29  ;;  %v274_v59 = vadd.f32 %v2928_v50, %v221_v56 }
 0x141   :  { %v370_v16 = vpop.f32.mrb[0].mxu0 }
 0x142   :  { %v446_v34 = vadd.f32 %v370_v16, %v272_v20  ;;  %v441_v36 = vpop.f32.mrb[0].mxu1  ;;  %v372_v37 = vpop.f32.mrb[1].mxu0 }
 0x143   :  { %v447_v38 = vadd.f32 %v372_v37, %v273_v23  ;;  %v443_v41 = vpop.f32.mrb[1].mxu1  ;;  %v448_v14 = vadd.f32 %v441_v36, %v274_v59  ;;  %v155_v59 = vpop.permute.xlu0 %154 }
 0x144   :  { %v1779_v46 = vmul.f32 -1.442695, %v446_v34  ;;  %v449_v57 = vadd.f32 %v443_v41, %v275_v49 }
 0x145   :  { %v1780_v47 = vmul.f32 -1.442695, %v447_v38 }
 0x146   :  { %2404 = vpow2.f32 %v1779_v46  ;;  %v1781_v10 = vmul.f32 -1.442695, %v449_v57  ;;  %v159_v57 = vrot.slane %v2824_v30, %v2915_v19 }
 0x147   :  { %2406 = vpow2.f32 %v1780_v47 }
 0x148   :  { %2408 = vpow2.f32 %v1781_v10  ;;  %161 = vbcast.lane.b32.xlu1 %v159_v57, 256  ;;  %v223_v10 = vmul.f32 %v2894_v60, %v155_v59 }
 0x149   :  { %2410 = vtanh.f32 %v448_v14  ;;  %v224_v14 = vmul.f32 %v2899_v63, %v155_v59 }
 0x150   :  { %v2405_v20 = vpop.eup %2404 }
 0x151   :  { %v2407_v16 = vpop.eup %2406  ;;  %v453_v23 = vadd.f32 1.0, %v2405_v20  ;;  %v276_v20 = vadd.f32 %v2905_v7, %v223_v10 }
 0x152   :  { %v459_v34 = vadd.f32 1.0, %v2407_v16  ;;  %v2409_v29 = vpop.eup %2408  ;;  %v277_v16 = vadd.f32 %v2908_v12, %v224_v14 }
 0x153   :  { %2412 = vrcp.f32 %v453_v23  ;;  %v2411_v61 = vpop.eup %2410  ;;  %v466_v1 = vadd.f32 1.0, %v2409_v29  ;;  %v226_v29 = vmul.f32 %v2912_v15, %v155_v59 }
 0x154   :  { %2414 = vrcp.f32 %v459_v34 }
 0x155   :  { %2416 = vrcp.f32 %v466_v1 }
 0x15d   :  { %v2413_v37 = vpop.eup %2412 }
 0x15e   :  { %v2415_v38 = vpop.eup %2414  ;;  %v470_v46 = vmul.f32 %v2413_v37, %v2411_v61 }
 0x15f   :  { %v469_v47 = vmul.f32 0.0, %v2415_v38  ;;  %v2417_v36 = vpop.eup %2416 }
 0x161   :  { %v2932_v41 = vadd.f32 %v470_v46, %v469_v47  ;;  %v279_v47 = vadd.f32 %v2920_v28, %v226_v29 }
 0x163   :  { %2418 = vtanh.f32 %v2932_v41 }
 0x16d   :  { %v2419_v49 = vpop.eup %2418 }
 0x16e   :  { %v473_v56 = vmul.f32 %v2419_v49, %v2417_v36  ;;  %v225_v36 = vmul.f32 %v2924_v33, %v155_v59 }
 0x170   :  { %539 = vmatmul.mubr.f32.vlgmr.msra.gmra.mrb[2].mxu0 %v473_v56  ;;  %610 = vmatmul.mubr.f32.vlgmr.msra.gmra.mrb[2].mxu1 %v473_v56  ;;  %v278_v56 = vadd.f32 %v2928_v50, %v225_v36 }
 0x171   :  { %1987 = vmatpush1.bf16.msra.mxu0 %v2752_v9  ;;  %2019 = vmatpush1.bf16.msra.mxu1 %v2755_v13 }
 0x172   :  { %1989 = vmatprep.subr.bf16.mxu0 %v2759_v17  ;;  %2021 = vmatprep.subr.bf16.mxu1 %v2761_v18 }
 0x173   :  { %708 = vmatprep.mubr.f32.mxu0 %v3252_v0  ;;  %779 = vmatprep.mubr.f32.mxu1 %v3252_v0 }
 0x175   :  { %1991 = vmatpush1.bf16.msra.mxu0 %v2764_v22  ;;  %2023 = vmatpush1.bf16.msra.mxu1 %v2768_v26 }
 0x176   :  { %1993 = vmatprep.subr.bf16.mxu0 %v2770_v27  ;;  %2025 = vmatprep.subr.bf16.mxu1 %v2772_v31 }
 0x179   :  { %1995 = vmatpush1.bf16.msra.mxu0 %v2775_v35  ;;  %2027 = vmatpush1.bf16.msra.mxu1 %v2779_v39 }
 0x17a   :  { %1997 = vmatprep.subr.bf16.mxu0 %v2781_v40  ;;  %2029 = vmatprep.subr.bf16.mxu1 %v2784_v44 }
 0x17d   :  { %1999 = vmatpush1.bf16.msra.mxu0 %v2787_v52  ;;  %2031 = vmatpush1.bf16.msra.mxu1 %v2791_v53 }
 0x17e   :  { %2001 = vmatprep.subr.bf16.mxu0 %v2793_v54  ;;  %2033 = vmatprep.subr.bf16.mxu1 %v2796_v58 }
 0x181   :  { %2003 = vmatpush1.bf16.msra.mxu0 %v2801_v2  ;;  %2035 = vmatpush1.bf16.msra.mxu1 %v2805_v3 }
 0x182   :  { %2005 = vmatprep.subr.bf16.mxu0 %v2807_v5  ;;  %2037 = vmatprep.subr.bf16.mxu1 %v2810_v11 }
 0x185   :  { %2007 = vmatpush1.bf16.msra.mxu0 %v2816_v21  ;;  %2039 = vmatpush1.bf16.msra.mxu1 %v2820_v24 }
 0x186   :  { %2009 = vmatprep.subr.bf16.mxu0 %v2822_v25  ;;  %2041 = vmatprep.subr.bf16.mxu1 %v2827_v32 }
 0x189   :  { %2011 = vmatpush1.bf16.msra.mxu0 %v2832_v42  ;;  %2043 = vmatpush1.bf16.msra.mxu1 %v2836_v43 }
 0x18a   :  { %2013 = vmatprep.subr.bf16.mxu0 %v2838_v45  ;;  %2045 = vmatprep.subr.bf16.mxu1 %v2841_v48 }
 0x18d   :  { %2015 = vmatpush1.bf16.msra.mxu0 %v2844_v51  ;;  %2047 = vmatpush1.bf16.msra.mxu1 %v2848_v55 }
 0x18e   :  { %2049 = vmatprep.subr.bf16.mxu0 %v2748_v4  ;;  %2081 = vmatprep.subr.bf16.mxu1 %v2750_v8 }
 0x243   :  { %v540_v23 = vpop.f32.mrb[2].mxu0  ;;  %v611_v34 = vpop.f32.mrb[2].mxu1 }
 0x244   :  { %v616_v61 = vadd.f32 %v540_v23, %v276_v20  ;;  %v542_v37 = vpop.f32.mrb[3].mxu0  ;;  %v613_v38 = vpop.f32.mrb[3].mxu1  ;;  %v618_v10 = vadd.f32 %v611_v34, %v278_v56 }
 0x245   :  { %v617_v46 = vadd.f32 %v542_v37, %v277_v16  ;;  %v619_v49 = vadd.f32 %v613_v38, %v279_v47 }
 0x246   :  { %v1782_v1 = vmul.f32 -1.442695, %v616_v61 }
 0x247   :  { %v1783_v19 = vmul.f32 -1.442695, %v617_v46  ;;  %v1784_v57 = vmul.f32 -1.442695, %v619_v49 }
 0x248   :  { %2420 = vpow2.f32 %v1782_v1 }
 0x249   :  { %2422 = vpow2.f32 %v1783_v19 }
 0x24a   :  { %2424 = vpow2.f32 %v1784_v57 }
 0x24b   :  { %2426 = vtanh.f32 %v618_v10 }
 0x252   :  { %v2421_v14 = vpop.eup %2420 }
 0x253   :  { %v2423_v0 = vpop.eup %2422  ;;  %v623_v62 = vadd.f32 1.0, %v2421_v14 }
 0x254   :  { %v629_v20 = vadd.f32 1.0, %v2423_v0  ;;  %v2425_v16 = vpop.eup %2424  ;;  %v3260_v0 = vmov 0.0  }
 0x255   :  { %2428 = vrcp.f32 %v623_v62  ;;  %v2427_v23 = vpop.eup %2426  ;;  %v636_v59 = vadd.f32 1.0, %v2425_v16  ;;  %v166_v62 = vrot.slane %v2824_v30, %v2902_v6 }
 0x256   :  { %2430 = vrcp.f32 %v629_v20 }
 0x257   :  { %2432 = vrcp.f32 %v636_v59  ;;  %168 = vbcast.lane.b32.xlu1 %v166_v62, 256 }
 0x25f   :  { %v2429_v29 = vpop.eup %2428 }
 0x260   :  { %v2431_v61 = vpop.eup %2430  ;;  %v640_v37 = vmul.f32 %v2429_v29, %v2427_v23 }
 0x261   :  { %v639_v38 = vmul.f32 %v2431_v61, %v2932_v41  ;;  %v2433_v34 = vpop.eup %2432  ;;  %v162_v41 = vpop.permute.xlu1 %161 }
 0x262   :  { %v227_v47 = vmul.f32 %v2894_v60, %v162_v41  ;;  %v228_v36 = vmul.f32 %v2899_v63, %v162_v41  ;;  %v230_v14 = vmul.f32 %v2912_v15, %v162_v41  ;;  %v229_v59 = vmul.f32 %v2924_v33, %v162_v41 }
 0x263   :  { %v2980_v46 = vadd.f32 %v640_v37, %v639_v38 }
 0x264   :  { %v280_v49 = vadd.f32 %v2905_v7, %v227_v47  ;;  %v281_v56 = vadd.f32 %v2908_v12, %v228_v36  ;;  %v283_v37 = vadd.f32 %v2920_v28, %v230_v14 }
 0x265   :  { %2434 = vtanh.f32 %v2980_v46 }
 0x26f   :  { %v2435_v1 = vpop.eup %2434 }
 0x270   :  { %v643_v19 = vmul.f32 %v2435_v1, %v2433_v34  ;;  %v282_v34 = vadd.f32 %v2928_v50, %v229_v59 }
 0x272   :  { %709 = vmatmul.mubr.f32.vlgmr.msra.gmra.mrb[4].mxu0 %v643_v19  ;;  %780 = vmatmul.mubr.f32.vlgmr.msra.gmra.mrb[4].mxu1 %v643_v19 }
 0x273   :  { %2051 = vmatpush1.bf16.msra.mxu0 %v2752_v9  ;;  %2083 = vmatpush1.bf16.msra.mxu1 %v2755_v13 }
 0x274   :  { %2053 = vmatprep.subr.bf16.mxu0 %v2759_v17  ;;  %2085 = vmatprep.subr.bf16.mxu1 %v2761_v18 }
 0x275   :  { %878 = vmatprep.mubr.f32.mxu0 %v3260_v0  ;;  %949 = vmatprep.mubr.f32.mxu1 %v3260_v0 }
 0x277   :  { %2055 = vmatpush1.bf16.msra.mxu0 %v2764_v22  ;;  %2087 = vmatpush1.bf16.msra.mxu1 %v2768_v26 }
 0x278   :  { %2057 = vmatprep.subr.bf16.mxu0 %v2770_v27  ;;  %2089 = vmatprep.subr.bf16.mxu1 %v2772_v31 }
 0x27b   :  { %2059 = vmatpush1.bf16.msra.mxu0 %v2775_v35  ;;  %2091 = vmatpush1.bf16.msra.mxu1 %v2779_v39 }
 0x27c   :  { %2061 = vmatprep.subr.bf16.mxu0 %v2781_v40  ;;  %2093 = vmatprep.subr.bf16.mxu1 %v2784_v44 }
 0x27f   :  { %2063 = vmatpush1.bf16.msra.mxu0 %v2787_v52  ;;  %2095 = vmatpush1.bf16.msra.mxu1 %v2791_v53 }
 0x280   :  { %2065 = vmatprep.subr.bf16.mxu0 %v2793_v54  ;;  %2097 = vmatprep.subr.bf16.mxu1 %v2796_v58 }
 0x283   :  { %2067 = vmatpush1.bf16.msra.mxu0 %v2801_v2  ;;  %2099 = vmatpush1.bf16.msra.mxu1 %v2805_v3 }
 0x284   :  { %2069 = vmatprep.subr.bf16.mxu0 %v2807_v5  ;;  %2101 = vmatprep.subr.bf16.mxu1 %v2810_v11 }
 0x287   :  { %2071 = vmatpush1.bf16.msra.mxu0 %v2816_v21  ;;  %2103 = vmatpush1.bf16.msra.mxu1 %v2820_v24 }
 0x288   :  { %2073 = vmatprep.subr.bf16.mxu0 %v2822_v25  ;;  %2105 = vmatprep.subr.bf16.mxu1 %v2827_v32 }
 0x28b   :  { %2075 = vmatpush1.bf16.msra.mxu0 %v2832_v42  ;;  %2107 = vmatpush1.bf16.msra.mxu1 %v2836_v43 }
 0x28c   :  { %2077 = vmatprep.subr.bf16.mxu0 %v2838_v45  ;;  %2109 = vmatprep.subr.bf16.mxu1 %v2841_v48 }
 0x28f   :  { %2079 = vmatpush1.bf16.msra.mxu0 %v2844_v51  ;;  %2111 = vmatpush1.bf16.msra.mxu1 %v2848_v55 }
 0x290   :  { %2113 = vmatprep.subr.bf16.mxu0 %v2748_v4  ;;  %2145 = vmatprep.subr.bf16.mxu1 %v2750_v8 }
 0x345   :  { %v710_v57 = vpop.f32.mrb[4].mxu0  ;;  %v781_v10 = vpop.f32.mrb[4].mxu1 }
 0x346   :  { %v786_v20 = vadd.f32 %v710_v57, %v280_v49  ;;  %v712_v16 = vpop.f32.mrb[5].mxu0  ;;  %v783_v23 = vpop.f32.mrb[5].mxu1  ;;  %v788_v19 = vadd.f32 %v781_v10, %v282_v34 }
 0x347   :  { %v787_v29 = vadd.f32 %v712_v16, %v281_v56  ;;  %v789_v38 = vadd.f32 %v783_v23, %v283_v37 }
 0x348   :  { %v1785_v61 = vmul.f32 -1.442695, %v786_v20 }
 0x349   :  { %v1786_v6 = vmul.f32 -1.442695, %v787_v29  ;;  %v1787_v1 = vmul.f32 -1.442695, %v789_v38  ;;  %v169_v38 = vpop.permute.xlu1 %168 }
 0x34a   :  { %2436 = vpow2.f32 %v1785_v61  ;;  %v231_v34 = vmul.f32 %v2894_v60, %v169_v38 }
 0x34b   :  { %2438 = vpow2.f32 %v1786_v6 }
 0x34c   :  { %2440 = vpow2.f32 %v1787_v1  ;;  %v232_v1 = vmul.f32 %v2899_v63, %v169_v38 }
 0x34d   :  { %2442 = vtanh.f32 %v788_v19  ;;  %v284_v19 = vadd.f32 %v2905_v7, %v231_v34 }
 0x354   :  { %v2437_v62 = vpop.eup %2436 }
 0x355   :  { %v2439_v47 = vpop.eup %2438  ;;  %v793_v36 = vadd.f32 1.0, %v2437_v62  ;;  %v285_v62 = vadd.f32 %v2908_v12, %v232_v1 }
 0x356   :  { %v799_v49 = vadd.f32 1.0, %v2439_v47  ;;  %v2441_v56 = vpop.eup %2440 }
 0x357   :  { %2444 = vrcp.f32 %v793_v36  ;;  %v2443_v57 = vpop.eup %2442  ;;  %v806_v41 = vadd.f32 1.0, %v2441_v56 }
 0x358   :  { %2446 = vrcp.f32 %v799_v49  ;;  %v234_v49 = vmul.f32 %v2912_v15, %v169_v38 }
 0x359   :  { %2448 = vrcp.f32 %v806_v41 }
 0x361   :  { %v2445_v14 = vpop.eup %2444 }
 0x362   :  { %v2447_v20 = vpop.eup %2446  ;;  %v810_v16 = vmul.f32 %v2445_v14, %v2443_v57 }
 0x363   :  { %v809_v23 = vmul.f32 %v2447_v20, %v2980_v46  ;;  %v2449_v10 = vpop.eup %2448  ;;  %v3261_v46 = vld [vmem:[#allocation15_spill] sm:$0xff] }
 0x364   :  { %v172_v37 = vsub.s32 4, %v3261_v46 }
 0x365   :  { %v3028_v29 = vadd.f32 %v810_v16, %v809_v23  ;;  %v287_v23 = vadd.f32 %v2920_v28, %v234_v49 }
 0x366   :  { %v173_v59 = vrot.slane %v2824_v30, %v172_v37 }
 0x367   :  { %2450 = vtanh.f32 %v3028_v29 }
 0x368   :  { %175 = vbcast.lane.b32.xlu0 %v173_v59, 256 }
 0x371   :  { %v2451_v61 = vpop.eup %2450 }
 0x372   :  { %v813_v6 = vmul.f32 %v2451_v61, %v2449_v10  ;;  %v233_v10 = vmul.f32 %v2924_v33, %v169_v38 }
 0x374   :  { %879 = vmatmul.mubr.f32.vlgmr.msra.gmra.mrb[6].mxu0 %v813_v6  ;;  %950 = vmatmul.mubr.f32.vlgmr.msra.gmra.mrb[6].mxu1 %v813_v6  ;;  %v286_v6 = vadd.f32 %v2928_v50, %v233_v10 }
 0x375   :  { %2115 = vmatpush1.bf16.msra.mxu0 %v2752_v9  ;;  %2147 = vmatpush1.bf16.msra.mxu1 %v2755_v13 }
 0x376   :  { %2117 = vmatprep.subr.bf16.mxu0 %v2759_v17  ;;  %2149 = vmatprep.subr.bf16.mxu1 %v2761_v18 }
 0x377   :  { %1048 = vmatprep.mubr.f32.mxu0 %v3260_v0  ;;  %1119 = vmatprep.mubr.f32.mxu1 %v3260_v0 }
 0x379   :  { %2119 = vmatpush1.bf16.msra.mxu0 %v2764_v22  ;;  %2151 = vmatpush1.bf16.msra.mxu1 %v2768_v26 }
 0x37a   :  { %2121 = vmatprep.subr.bf16.mxu0 %v2770_v27  ;;  %2153 = vmatprep.subr.bf16.mxu1 %v2772_v31 }
 0x37d   :  { %2123 = vmatpush1.bf16.msra.mxu0 %v2775_v35  ;;  %2155 = vmatpush1.bf16.msra.mxu1 %v2779_v39 }
 0x37e   :  { %2125 = vmatprep.subr.bf16.mxu0 %v2781_v40  ;;  %2157 = vmatprep.subr.bf16.mxu1 %v2784_v44 }
 0x381   :  { %2127 = vmatpush1.bf16.msra.mxu0 %v2787_v52  ;;  %2159 = vmatpush1.bf16.msra.mxu1 %v2791_v53 }
 0x382   :  { %2129 = vmatprep.subr.bf16.mxu0 %v2793_v54  ;;  %2161 = vmatprep.subr.bf16.mxu1 %v2796_v58 }
 0x385   :  { %2131 = vmatpush1.bf16.msra.mxu0 %v2801_v2  ;;  %2163 = vmatpush1.bf16.msra.mxu1 %v2805_v3 }
 0x386   :  { %2133 = vmatprep.subr.bf16.mxu0 %v2807_v5  ;;  %2165 = vmatprep.subr.bf16.mxu1 %v2810_v11 }
 0x389   :  { %2135 = vmatpush1.bf16.msra.mxu0 %v2816_v21  ;;  %2167 = vmatpush1.bf16.msra.mxu1 %v2820_v24 }
 0x38a   :  { %2137 = vmatprep.subr.bf16.mxu0 %v2822_v25  ;;  %2169 = vmatprep.subr.bf16.mxu1 %v2827_v32 }
 0x38d   :  { %2139 = vmatpush1.bf16.msra.mxu0 %v2832_v42  ;;  %2171 = vmatpush1.bf16.msra.mxu1 %v2836_v43 }
 0x38e   :  { %2141 = vmatprep.subr.bf16.mxu0 %v2838_v45  ;;  %2173 = vmatprep.subr.bf16.mxu1 %v2841_v48 }
 0x391   :  { %2143 = vmatpush1.bf16.msra.mxu0 %v2844_v51  ;;  %2175 = vmatpush1.bf16.msra.mxu1 %v2848_v55 }
 0x392   :  { %2177 = vmatprep.subr.bf16.mxu0 %v2748_v4  ;;  %2209 = vmatprep.subr.bf16.mxu1 %v2750_v8 }
 0x447   :  { %v880_v47 = vpop.f32.mrb[6].mxu0  ;;  %v951_v36 = vpop.f32.mrb[6].mxu1 }
 0x448   :  { %v956_v56 = vadd.f32 %v880_v47, %v284_v19  ;;  %v882_v57 = vpop.f32.mrb[7].mxu0  ;;  %v953_v14 = vpop.f32.mrb[7].mxu1  ;;  %v958_v59 = vadd.f32 %v951_v36, %v286_v6 }
 0x449   :  { %v957_v20 = vadd.f32 %v882_v57, %v285_v62  ;;  %v959_v61 = vadd.f32 %v953_v14, %v287_v23  ;;  %v176_v23 = vpop.permute.xlu0 %175 }
 0x44a   :  { %v1788_v16 = vmul.f32 -1.442695, %v956_v56  ;;  %v235_v10 = vmul.f32 %v2894_v60, %v176_v23 }
 0x44b   :  { %v1789_v41 = vmul.f32 -1.442695, %v957_v20  ;;  %v1790_v37 = vmul.f32 -1.442695, %v959_v61  ;;  %v236_v61 = vmul.f32 %v2899_v63, %v176_v23 }
 0x44c   :  { %2452 = vpow2.f32 %v1788_v16  ;;  %v288_v6 = vadd.f32 %v2905_v7, %v235_v10 }
 0x44d   :  { %2454 = vpow2.f32 %v1789_v41 }
 0x44e   :  { %2456 = vpow2.f32 %v1790_v37  ;;  %v289_v37 = vadd.f32 %v2908_v12, %v236_v61 }
 0x44f   :  { %2458 = vtanh.f32 %v958_v59 }
 0x456   :  { %v2453_v34 = vpop.eup %2452 }
 0x457   :  { %v2455_v1 = vpop.eup %2454  ;;  %v963_v15 = vadd.f32 1.0, %v2453_v34 }
 0x458   :  { %v969_v19 = vadd.f32 1.0, %v2455_v1  ;;  %v2457_v62 = vpop.eup %2456  ;;  %v3262_v1 = vld [vmem:[#allocation16_spill] sm:$0xff] }
 0x459   :  { %2460 = vrcp.f32 %v963_v15  ;;  %v2459_v47 = vpop.eup %2458  ;;  %v976_v38 = vadd.f32 1.0, %v2457_v62  ;;  %v179_v15 = vsub.s32 5, %v3261_v46 }
 0x45a   :  { %2462 = vrcp.f32 %v969_v19  ;;  %v238_v19 = vmul.f32 %v3262_v1, %v176_v23 }
 0x45b   :  { %2464 = vrcp.f32 %v976_v38 }
 0x463   :  { %v2461_v49 = vpop.eup %2460 }
 0x464   :  { %v2463_v56 = vpop.eup %2462  ;;  %v980_v57 = vmul.f32 %v2461_v49, %v2459_v47 }
 0x465   :  { %v979_v14 = vmul.f32 %v2463_v56, %v3028_v29  ;;  %v2465_v36 = vpop.eup %2464  ;;  %v180_v29 = vrot.slane %v2824_v30, %v179_v15 }
 0x467   :  { %v3076_v20 = vadd.f32 %v980_v57, %v979_v14  ;;  %182 = vbcast.lane.b32.xlu1 %v180_v29, 256  ;;  %v291_v14 = vadd.f32 %v2920_v28, %v238_v19 }
 0x469   :  { %2466 = vtanh.f32 %v3076_v20 }
 0x473   :  { %v2467_v16 = vpop.eup %2466 }
 0x474   :  { %v983_v41 = vmul.f32 %v2467_v16, %v2465_v36  ;;  %v237_v36 = vmul.f32 %v2924_v33, %v176_v23 }
 0x476   :  { %1049 = vmatmul.mubr.f32.vlgmr.msra.gmra.mrb[8].mxu0 %v983_v41  ;;  %1120 = vmatmul.mubr.f32.vlgmr.msra.gmra.mrb[8].mxu1 %v983_v41  ;;  %v290_v41 = vadd.f32 %v2928_v50, %v237_v36 }
 0x477   :  { %2179 = vmatpush1.bf16.msra.mxu0 %v2752_v9  ;;  %2211 = vmatpush1.bf16.msra.mxu1 %v2755_v13 }
 0x478   :  { %2181 = vmatprep.subr.bf16.mxu0 %v2759_v17  ;;  %2213 = vmatprep.subr.bf16.mxu1 %v2761_v18 }
 0x479   :  { %1218 = vmatprep.mubr.f32.mxu0 %v3260_v0  ;;  %1289 = vmatprep.mubr.f32.mxu1 %v3260_v0 }
 0x47b   :  { %2183 = vmatpush1.bf16.msra.mxu0 %v2764_v22  ;;  %2215 = vmatpush1.bf16.msra.mxu1 %v2768_v26 }
 0x47c   :  { %2185 = vmatprep.subr.bf16.mxu0 %v2770_v27  ;;  %2217 = vmatprep.subr.bf16.mxu1 %v2772_v31 }
 0x47f   :  { %2187 = vmatpush1.bf16.msra.mxu0 %v2775_v35  ;;  %2219 = vmatpush1.bf16.msra.mxu1 %v2779_v39 }
 0x480   :  { %2189 = vmatprep.subr.bf16.mxu0 %v2781_v40  ;;  %2221 = vmatprep.subr.bf16.mxu1 %v2784_v44 }
 0x483   :  { %2191 = vmatpush1.bf16.msra.mxu0 %v2787_v52  ;;  %2223 = vmatpush1.bf16.msra.mxu1 %v2791_v53 }
 0x484   :  { %2193 = vmatprep.subr.bf16.mxu0 %v2793_v54  ;;  %2225 = vmatprep.subr.bf16.mxu1 %v2796_v58 }
 0x487   :  { %2195 = vmatpush1.bf16.msra.mxu0 %v2801_v2  ;;  %2227 = vmatpush1.bf16.msra.mxu1 %v2805_v3 }
 0x488   :  { %2197 = vmatprep.subr.bf16.mxu0 %v2807_v5  ;;  %2229 = vmatprep.subr.bf16.mxu1 %v2810_v11 }
 0x48b   :  { %2199 = vmatpush1.bf16.msra.mxu0 %v2816_v21  ;;  %2231 = vmatpush1.bf16.msra.mxu1 %v2820_v24 }
 0x48c   :  { %2201 = vmatprep.subr.bf16.mxu0 %v2822_v25  ;;  %2233 = vmatprep.subr.bf16.mxu1 %v2827_v32 }
 0x48f   :  { %2203 = vmatpush1.bf16.msra.mxu0 %v2832_v42  ;;  %2235 = vmatpush1.bf16.msra.mxu1 %v2836_v43 }
 0x490   :  { %2205 = vmatprep.subr.bf16.mxu0 %v2838_v45  ;;  %2237 = vmatprep.subr.bf16.mxu1 %v2841_v48 }
 0x493   :  { %2207 = vmatpush1.bf16.msra.mxu0 %v2844_v51  ;;  %2239 = vmatpush1.bf16.msra.mxu1 %v2848_v55 }
 0x494   :  { %2241 = vmatprep.subr.bf16.mxu0 %v2748_v4  ;;  %2273 = vmatprep.subr.bf16.mxu1 %v2750_v8 }
 0x549   :  { %v1050_v59 = vpop.f32.mrb[8].mxu0  ;;  %v1121_v34 = vpop.f32.mrb[8].mxu1 }
 0x54a   :  { %v1126_v62 = vadd.f32 %v1050_v59, %v288_v6  ;;  %v1052_v47 = vpop.f32.mrb[9].mxu0  ;;  %v1123_v49 = vpop.f32.mrb[9].mxu1  ;;  %v1128_v29 = vadd.f32 %v1121_v34, %v290_v41 }
 0x54b   :  { %v1127_v56 = vadd.f32 %v1052_v47, %v289_v37  ;;  %v1129_v16 = vadd.f32 %v1123_v49, %v291_v14  ;;  %v183_v14 = vpop.permute.xlu1 %182 }
 0x54c   :  { %v1791_v57 = vmul.f32 -1.442695, %v1126_v62  ;;  %v239_v36 = vmul.f32 %v2894_v60, %v183_v14 }
 0x54d   :  { %v1792_v38 = vmul.f32 -1.442695, %v1127_v56  ;;  %v1793_v15 = vmul.f32 -1.442695, %v1129_v16  ;;  %v240_v16 = vmul.f32 %v2899_v63, %v183_v14 }
 0x54e   :  { %2468 = vpow2.f32 %v1791_v57  ;;  %v292_v41 = vadd.f32 %v2905_v7, %v239_v36 }
 0x54f   :  { %2470 = vpow2.f32 %v1792_v38 }
 0x550   :  { %2472 = vpow2.f32 %v1793_v15  ;;  %v293_v15 = vadd.f32 %v2908_v12, %v240_v16 }
 0x551   :  { %2474 = vtanh.f32 %v1128_v29 }
 0x558   :  { %v2469_v10 = vpop.eup %2468 }
 0x559   :  { %v2471_v61 = vpop.eup %2470  ;;  %v1133_v1 = vadd.f32 1.0, %v2469_v10 }
 0x55a   :  { %v1139_v6 = vadd.f32 1.0, %v2471_v61  ;;  %v2473_v37 = vpop.eup %2472  ;;  %v3263_v61 = vld [vmem:[#allocation16_spill] sm:$0xff] }
 0x55b   :  { %2476 = vrcp.f32 %v1133_v1  ;;  %v2475_v59 = vpop.eup %2474  ;;  %v1146_v23 = vadd.f32 1.0, %v2473_v37 }
 0x55c   :  { %2478 = vrcp.f32 %v1139_v6 }
 0x55d   :  { %2480 = vrcp.f32 %v1146_v23 }
 0x565   :  { %v2477_v19 = vpop.eup %2476 }
 0x566   :  { %v2479_v62 = vpop.eup %2478  ;;  %v1150_v47 = vmul.f32 %v2477_v19, %v2475_v59 }
 0x567   :  { %v1149_v49 = vmul.f32 %v2479_v62, %v3076_v20  ;;  %v2481_v34 = vpop.eup %2480  ;;  %v186_v20 = vsub.s32 6, %v3261_v46 }
 0x569   :  { %v3124_v56 = vadd.f32 %v1150_v47, %v1149_v49  ;;  %v187_v1 = vrot.slane %v2824_v30, %v186_v20  ;;  %v241_v47 = vmul.f32 %v2924_v33, %v183_v14 }
 0x56b   :  { %2482 = vtanh.f32 %v3124_v56  ;;  %189 = vbcast.lane.b32.xlu0 %v187_v1, 256  ;;  %v294_v49 = vadd.f32 %v2928_v50, %v241_v47 }
 0x575   :  { %v2483_v57 = vpop.eup %2482 }
 0x576   :  { %v1153_v38 = vmul.f32 %v2483_v57, %v2481_v34 }
 0x578   :  { %1219 = vmatmul.mubr.f32.vlgmr.msra.gmra.mrb[10].mxu0 %v1153_v38  ;;  %1290 = vmatmul.mubr.f32.vlgmr.msra.gmra.mrb[10].mxu1 %v1153_v38 }
 0x579   :  { %2243 = vmatpush1.bf16.msra.mxu0 %v2752_v9  ;;  %2275 = vmatpush1.bf16.msra.mxu1 %v2755_v13 }
 0x57a   :  { %2245 = vmatprep.subr.bf16.mxu0 %v2759_v17  ;;  %2277 = vmatprep.subr.bf16.mxu1 %v2761_v18 }
 0x57b   :  { %1388 = vmatprep.mubr.f32.mxu0 %v3260_v0  ;;  %1459 = vmatprep.mubr.f32.mxu1 %v3260_v0 }
 0x57d   :  { %2247 = vmatpush1.bf16.msra.mxu0 %v2764_v22  ;;  %2279 = vmatpush1.bf16.msra.mxu1 %v2768_v26 }
 0x57e   :  { %2249 = vmatprep.subr.bf16.mxu0 %v2770_v27  ;;  %2281 = vmatprep.subr.bf16.mxu1 %v2772_v31 }
 0x581   :  { %2251 = vmatpush1.bf16.msra.mxu0 %v2775_v35  ;;  %2283 = vmatpush1.bf16.msra.mxu1 %v2779_v39 }
 0x582   :  { %2253 = vmatprep.subr.bf16.mxu0 %v2781_v40  ;;  %2285 = vmatprep.subr.bf16.mxu1 %v2784_v44 }
 0x585   :  { %2255 = vmatpush1.bf16.msra.mxu0 %v2787_v52  ;;  %2287 = vmatpush1.bf16.msra.mxu1 %v2791_v53 }
 0x586   :  { %2257 = vmatprep.subr.bf16.mxu0 %v2793_v54  ;;  %2289 = vmatprep.subr.bf16.mxu1 %v2796_v58 }
 0x589   :  { %2259 = vmatpush1.bf16.msra.mxu0 %v2801_v2  ;;  %2291 = vmatpush1.bf16.msra.mxu1 %v2805_v3 }
 0x58a   :  { %2261 = vmatprep.subr.bf16.mxu0 %v2807_v5  ;;  %2293 = vmatprep.subr.bf16.mxu1 %v2810_v11 }
 0x58d   :  { %2263 = vmatpush1.bf16.msra.mxu0 %v2816_v21  ;;  %2295 = vmatpush1.bf16.msra.mxu1 %v2820_v24 }
 0x58e   :  { %2265 = vmatprep.subr.bf16.mxu0 %v2822_v25  ;;  %2297 = vmatprep.subr.bf16.mxu1 %v2827_v32 }
 0x591   :  { %2267 = vmatpush1.bf16.msra.mxu0 %v2832_v42  ;;  %2299 = vmatpush1.bf16.msra.mxu1 %v2836_v43 }
 0x592   :  { %2269 = vmatprep.subr.bf16.mxu0 %v2838_v45  ;;  %2301 = vmatprep.subr.bf16.mxu1 %v2841_v48 }
 0x595   :  { %2271 = vmatpush1.bf16.msra.mxu0 %v2844_v51  ;;  %2303 = vmatpush1.bf16.msra.mxu1 %v2848_v55 }
 0x596   :  { %2305 = vmatprep.subr.bf16.mxu0 %v2748_v4  ;;  %2337 = vmatprep.subr.bf16.mxu1 %v2750_v8  ;;  %v242_v4 = vmul.f32 %v3263_v61, %v183_v14 }
 0x598   :  { %v295_v62 = vadd.f32 %v2920_v28, %v242_v4 }
 0x64b   :  { %v1220_v29 = vpop.f32.mrb[10].mxu0  ;;  %v1291_v10 = vpop.f32.mrb[10].mxu1 }
 0x64c   :  { %v1296_v6 = vadd.f32 %v1220_v29, %v292_v41  ;;  %v1222_v8 = vpop.f32.mrb[11].mxu0  ;;  %v1293_v37 = vpop.f32.mrb[11].mxu1  ;;  %v1298_v57 = vadd.f32 %v1291_v10, %v294_v49 }
 0x64d   :  { %v1297_v59 = vadd.f32 %v1222_v8, %v293_v15  ;;  %v1299_v23 = vadd.f32 %v1293_v37, %v295_v62 }
 0x64e   :  { %v1794_v19 = vmul.f32 -1.442695, %v1296_v6 }
 0x64f   :  { %v1795_v30 = vmul.f32 -1.442695, %v1297_v59  ;;  %v1796_v34 = vmul.f32 -1.442695, %v1299_v23 }
 0x650   :  { %2484 = vpow2.f32 %v1794_v19 }
 0x651   :  { %2486 = vpow2.f32 %v1795_v30 }
 0x652   :  { %2488 = vpow2.f32 %v1796_v34  ;;  %v1666_v34 = vld [vmem:[#allocation8] sm:$0xff] }
 0x653   :  { %2490 = vtanh.f32 %v1298_v57  ;;  %v1667_v57 = vld [vmem:[#allocation8 + $0x8] sm:$0xff] }
 0x65a   :  { %v2485_v38 = vpop.eup %2484 }
 0x65b   :  { %v2487_v20 = vpop.eup %2486  ;;  %v1303_v1 = vadd.f32 1.0, %v2485_v38  ;;  %v2369_v38 = vpack.c.bf16 %v1667_v57, %v1666_v34 }
 0x65c   :  { %v1309_v36 = vadd.f32 1.0, %v2487_v20  ;;  %v2489_v16 = vpop.eup %2488  ;;  %v2660_v20 = vmov 0.0|0.0  }
 0x65d   :  { %2492 = vrcp.f32 %v1303_v1  ;;  %v2491_v41 = vpop.eup %2490  ;;  %v1316_v14 = vadd.f32 1.0, %v2489_v16  ;;  %v1668_v1 = vld [vmem:[#allocation8 + $0x10] sm:$0xff] }
 0x65e   :  { %2494 = vrcp.f32 %v1309_v36  ;;  %v1669_v36 = vld [vmem:[#allocation8 + $0x18] sm:$0xff] }
 0x65f   :  { %2496 = vrcp.f32 %v1316_v14  ;;  %v2372_v16 = vpack.c.bf16 %v1669_v36, %v1668_v1  ;;  %v1673_v14 = vld [vmem:[#allocation8 + $0x38] sm:$0xff] }
 0x667   :  { %v2493_v15 = vpop.eup %2492 }
 0x668   :  { %v2495_v29 = vpop.eup %2494  ;;  %v1320_v4 = vmul.f32 %v2493_v15, %v2491_v41  ;;  %v1670_v41 = vld [vmem:[#allocation8 + $0x20] sm:$0xff]  ;;  %v1671_v15 = vld [vmem:[#allocation8 + $0x28] sm:$0xff] }
 0x669   :  { %v1319_v6 = vmul.f32 %v2495_v29, %v3124_v56  ;;  %v2497_v10 = vpop.eup %2496  ;;  %v2375_v29 = vpack.c.bf16 %v1671_v15, %v1670_v41 }
 0x66b   :  { %v3172_v8 = vadd.f32 %v1320_v4, %v1319_v6  ;;  %v1672_v4 = vld [vmem:[#allocation8 + $0x30] sm:$0xff] }
 0x66c   :  { %v2378_v6 = vpack.c.bf16 %v1673_v14, %v1672_v4 }
 0x66d   :  { %2498 = vtanh.f32 %v3172_v8 }
 0x677   :  { %v2499_v37 = vpop.eup %2498 }
 0x678   :  { %v1323_v59 = vmul.f32 %v2499_v37, %v2497_v10  ;;  %v1675_v10 = vld [vmem:[#allocation8 + $0x48] sm:$0xff]  ;;  %v1676_v37 = vld [vmem:[#allocation8 + $0x50] sm:$0xff] }
 0x67a   :  { %1389 = vmatmul.mubr.f32.vlgmr.msra.gmra.mrb[12].mxu0 %v1323_v59  ;;  %1460 = vmatmul.mubr.f32.vlgmr.msra.gmra.mrb[12].mxu1 %v1323_v59 }
 0x67b   :  { %2307 = vmatpush1.bf16.msra.mxu0 %v2752_v9  ;;  %2339 = vmatpush1.bf16.msra.mxu1 %v2755_v13  ;;  %v193_v9 = vsub.s32 7, %v3261_v46  ;;  %v2532_v13 = vld [vmem:[#allocation2] sm:$0xff] }
 0x67c   :  { %2309 = vmatprep.subr.bf16.mxu0 %v2759_v17  ;;  %2341 = vmatprep.subr.bf16.mxu1 %v2761_v18  ;;  %v190_v18 = vpop.permute.xlu0 %189 }
 0x67d   :  { %1558 = vmatprep.mubr.f32.mxu0 %v3260_v0  ;;  %1629 = vmatprep.mubr.f32.mxu1 %v3260_v0  ;;  %v194_v17 = vrot.slane %v2532_v13, %v193_v9  ;;  %v1677_v9 = vld [vmem:[#allocation8 + $0x58] sm:$0xff] }
 0x67e   :  { %v2384_v13 = vpack.c.bf16 %v1677_v9, %v1676_v37 }
 0x67f   :  { %2311 = vmatpush1.bf16.msra.mxu0 %v2764_v22  ;;  %2343 = vmatpush1.bf16.msra.mxu1 %v2768_v26  ;;  %v243_v22 = vmul.f32 %v2894_v60, %v190_v18  ;;  %v244_v26 = vmul.f32 %v2899_v63, %v190_v18 }
 0x680   :  { %2313 = vmatprep.subr.bf16.mxu0 %v2770_v27  ;;  %2345 = vmatprep.subr.bf16.mxu1 %v2772_v31 }
 0x681   :  { %196 = vbcast.lane.b32.xlu1 %v194_v17, 256  ;;  %v296_v27 = vadd.f32 %v2905_v7, %v243_v22  ;;  %v297_v31 = vadd.f32 %v2908_v12, %v244_v26  ;;  %v1678_v17 = vld [vmem:[#allocation8 + $0x60] sm:$0xff]  ;;  %v1680_v26 = vld [vmem:[#allocation8 + $0x70] sm:$0xff] }
 0x683   :  { %2315 = vmatpush1.bf16.msra.mxu0 %v2775_v35  ;;  %2347 = vmatpush1.bf16.msra.mxu1 %v2779_v39  ;;  %v246_v35 = vmul.f32 %v3263_v61, %v190_v18 }
 0x684   :  { %2317 = vmatprep.subr.bf16.mxu0 %v2781_v40  ;;  %2349 = vmatprep.subr.bf16.mxu1 %v2784_v44 }
 0x687   :  { %2319 = vmatpush1.bf16.msra.mxu0 %v2787_v52  ;;  %2351 = vmatpush1.bf16.msra.mxu1 %v2791_v53 }
 0x688   :  { %2321 = vmatprep.subr.bf16.mxu0 %v2793_v54  ;;  %2353 = vmatprep.subr.bf16.mxu1 %v2796_v58 }
 0x68b   :  { %2323 = vmatpush1.bf16.msra.mxu0 %v2801_v2  ;;  %2355 = vmatpush1.bf16.msra.mxu1 %v2805_v3  ;;  %v299_v3 = vadd.f32 %v2920_v28, %v246_v35 }
 0x68c   :  { %2325 = vmatprep.subr.bf16.mxu0 %v2807_v5  ;;  %2357 = vmatprep.subr.bf16.mxu1 %v2810_v11  ;;  %v245_v5 = vmul.f32 %v2924_v33, %v190_v18  ;;  %v1679_v18 = vld [vmem:[#allocation8 + $0x68] sm:$0xff] }
 0x68d   :  { %v2387_v22 = vpack.c.bf16 %v1679_v18, %v1678_v17 }
 0x68f   :  { %2327 = vmatpush1.bf16.msra.mxu0 %v2816_v21  ;;  %2359 = vmatpush1.bf16.msra.mxu1 %v2820_v24  ;;  %v298_v21 = vadd.f32 %v2928_v50, %v245_v5 }
 0x690   :  { %2329 = vmatprep.subr.bf16.mxu0 %v2822_v25  ;;  %2361 = vmatprep.subr.bf16.mxu1 %v2827_v32 }
 0x693   :  { %2331 = vmatpush1.bf16.msra.mxu0 %v2832_v42  ;;  %2363 = vmatpush1.bf16.msra.mxu1 %v2836_v43 }
 0x694   :  { %2333 = vmatprep.subr.bf16.mxu0 %v2838_v45  ;;  %2365 = vmatprep.subr.bf16.mxu1 %v2841_v48 }
 0x697   :  { %2335 = vmatpush1.bf16.msra.mxu0 %v2844_v51  ;;  %2367 = vmatpush1.bf16.msra.mxu1 %v2848_v55 }
 0x698   :  { %2368 = vmatprep.subr.bf16.mxu0 %v2660_v20 }
 0x6f3   :  { %v197_v35 = vpop.permute.xlu1 %196 }
 0x74d   :  { %v1390_v39 = vpop.f32.mrb[12].mxu0  ;;  %v1461_v40 = vpop.f32.mrb[12].mxu1 }
 0x74e   :  { %v1466_v44 = vadd.f32 %v1390_v39, %v296_v27  ;;  %v1392_v52 = vpop.f32.mrb[13].mxu0  ;;  %v1463_v53 = vpop.f32.mrb[13].mxu1  ;;  %v1468_v25 = vadd.f32 %v1461_v40, %v298_v21  ;;  %v1681_v27 = vld [vmem:[#allocation8 + $0x78] sm:$0xff]  ;;  %v247_v39 = vmul.f32 %v2894_v60, %v197_v35  ;;  %v248_v40 = vmul.f32 %v2899_v63, %v197_v35 }
 0x74f   :  { %v1467_v54 = vadd.f32 %v1392_v52, %v297_v31  ;;  %v1469_v11 = vadd.f32 %v1463_v53, %v299_v3  ;;  %v2390_v31 = vpack.c.bf16 %v1681_v27, %v1680_v26  ;;  %v250_v52 = vmul.f32 %v3263_v61, %v197_v35 }
 0x750   :  { %v1797_v58 = vmul.f32 -1.442695, %v1466_v44  ;;  %v301_v44 = vadd.f32 %v2908_v12, %v248_v40  ;;  %v249_v60 = vmul.f32 %v2924_v33, %v197_v35 }
 0x751   :  { %v1798_v2 = vmul.f32 -1.442695, %v1467_v54  ;;  %v1799_v24 = vmul.f32 -1.442695, %v1469_v11 }
 0x752   :  { %2500 = vpow2.f32 %v1797_v58 }
 0x753   :  { %2502 = vpow2.f32 %v1798_v2 }
 0x754   :  { %2504 = vpow2.f32 %v1799_v24  ;;  %v303_v24 = vadd.f32 %v2920_v28, %v250_v52 }
 0x755   :  { %2506 = vtanh.f32 %v1468_v25 }
 0x75c   :  { %v2501_v32 = vpop.eup %2500 }
 0x75d   :  { %v2503_v42 = vpop.eup %2502  ;;  %v1473_v43 = vadd.f32 1.0, %v2501_v32 }
 0x75e   :  { %v1479_v45 = vadd.f32 1.0, %v2503_v42  ;;  %v2505_v48 = vpop.eup %2504 }
 0x75f   :  { %2508 = vrcp.f32 %v1473_v43  ;;  %v2507_v51 = vpop.eup %2506  ;;  %v1486_v19 = vadd.f32 1.0, %v2505_v48 }
 0x760   :  { %2510 = vrcp.f32 %v1479_v45 }
 0x761   :  { %2512 = vrcp.f32 %v1486_v19 }
 0x769   :  { %v2509_v55 = vpop.eup %2508 }
 0x76a   :  { %v2511_v46 = vpop.eup %2510  ;;  %v1490_v56 = vmul.f32 %v2509_v55, %v2507_v51 }
 0x76b   :  { %v1489_v30 = vmul.f32 %v2511_v46, %v3172_v8  ;;  %v2513_v47 = vpop.eup %2512  ;;  %v1674_v8 = vld [vmem:[#allocation8 + $0x40] sm:$0xff] }
 0x76c   :  { %v2381_v59 = vpack.c.bf16 %v1675_v10, %v1674_v8 }
 0x76d   :  { %v3217_v62 = vadd.f32 %v1490_v56, %v1489_v30 }
 0x76f   :  { %2514 = vtanh.f32 %v3217_v62 }
 0x779   :  { %v2515_v23 = vpop.eup %2514 }
 0x77a   :  { %v1493_v49 = vmul.f32 %v2515_v23, %v2513_v47 }
 0x77c   :  { %1559 = vmatmul.mubr.f32.vlgmr.msra.gmra.mrb[14].mxu0 %v1493_v49  ;;  %1630 = vmatmul.mubr.f32.vlgmr.msra.gmra.mrb[14].mxu1 %v1493_v49  ;;  %v1803_v49 = vld [vmem:[%s3250_s5] ss:$0 sm:$0xff] }
 0x77d   :  { %2370 = vmatpush3.bf16.msra.mxu0 %v2369_v38  ;;  %1853 = vmatprep.mubr.msk.f32.mxu0 %vm2661_vm0, %v3260_v0  ;;  %v300_v0 = vadd.f32 %v2905_v7, %v247_v39  ;;  %v302_v7 = vadd.f32 %v2928_v50, %v249_v60 }
 0x77e   :  { %2371 = vmatprep.subr.bf16.mxu0 %v2660_v20 }
 0x781   :  { %2373 = vmatpush3.bf16.msra.mxu0 %v2372_v16 }
 0x782   :  { %2374 = vmatprep.subr.bf16.mxu0 %v2660_v20 }
 0x785   :  { %2376 = vmatpush3.bf16.msra.mxu0 %v2375_v29 }
 0x786   :  { %2377 = vmatprep.subr.bf16.mxu0 %v2660_v20 }
 0x789   :  { %2379 = vmatpush3.bf16.msra.mxu0 %v2378_v6 }
 0x78a   :  { %2380 = vmatprep.subr.bf16.mxu0 %v2660_v20 }
 0x78d   :  { %2382 = vmatpush3.bf16.msra.mxu0 %v2381_v59 }
 0x78e   :  { %2383 = vmatprep.subr.bf16.mxu0 %v2660_v20 }
 0x791   :  { %2385 = vmatpush3.bf16.msra.mxu0 %v2384_v13 }
 0x792   :  { %2386 = vmatprep.subr.bf16.mxu0 %v2660_v20 }
 0x795   :  { %2388 = vmatpush3.bf16.msra.mxu0 %v2387_v22 }
 0x796   :  { %2389 = vmatprep.subr.bf16.mxu0 %v2660_v20 }
 0x799   :  { %2391 = vmatpush3.bf16.msra.mxu0 %v2390_v31 }
 0x84f   :  { %v1560_v53 = vpop.f32.mrb[14].mxu0  ;;  %v1631_v54 = vpop.f32.mrb[14].mxu1 }
 0x850   :  { %v1636_v58 = vadd.f32 %v1560_v53, %v300_v0  ;;  %v1562_v2 = vpop.f32.mrb[15].mxu0  ;;  %v1633_v3 = vpop.f32.mrb[15].mxu1  ;;  %v1638_v25 = vadd.f32 %v1631_v54, %v302_v7 }
 0x851   :  { %v1637_v5 = vadd.f32 %v1562_v2, %v301_v44  ;;  %v1639_v63 = vadd.f32 %v1633_v3, %v303_v24 }
 0x852   :  { %v1800_v11 = vmul.f32 -1.442695, %v1636_v58 }
 0x853   :  { %v1801_v21 = vmul.f32 -1.442695, %v1637_v5  ;;  %v1802_v12 = vmul.f32 -1.442695, %v1639_v63 }
 0x854   :  { %2516 = vpow2.f32 %v1800_v11 }
 0x855   :  { %2518 = vpow2.f32 %v1801_v21 }
 0x856   :  { %2520 = vpow2.f32 %v1802_v12 }
 0x857   :  { %2522 = vtanh.f32 %v1638_v25 }
 0x85e   :  { %v2517_v61 = vpop.eup %2516 }
 0x85f   :  { %v2519_v32 = vpop.eup %2518  ;;  %v1643_v42 = vadd.f32 1.0, %v2517_v61 }
 0x860   :  { %v1649_v43 = vadd.f32 1.0, %v2519_v32  ;;  %v2521_v45 = vpop.eup %2520 }
 0x861   :  { %2524 = vrcp.f32 %v1643_v42  ;;  %v2523_v48 = vpop.eup %2522  ;;  %v1656_v55 = vadd.f32 1.0, %v2521_v45 }
 0x862   :  { %2526 = vrcp.f32 %v1649_v43 }
 0x863   :  { %2528 = vrcp.f32 %v1656_v55 }
 0x86b   :  { %v2525_v28 = vpop.eup %2524 }
 0x86c   :  { %v2527_v51 = vpop.eup %2526  ;;  %v1660_v33 = vmul.f32 %v2525_v28, %v2523_v48 }
 0x86d   :  { %v1659_v46 = vmul.f32 %v2527_v51, %v3217_v62  ;;  %v2529_v50 = vpop.eup %2528 }
 0x86f   :  { %v1661_v56 = vadd.f32 %v1660_v33, %v1659_v46 }
 0x871   :  { %2530 = vtanh.f32 %v1661_v56 }
 0x87b   :  { %v2531_v19 = vpop.eup %2530 }
 0x87c   :  { %v1663_v30 = vmul.f32 %v2531_v19, %v2529_v50 }
 0x87e   :  { %v1664_v47 = vmax.f32 %v1663_v30, 0.0 }
 0x880   :  { %v1665_v23 = vmin.f32 %v1664_v47, 6.0 }
 0x882   :  { %1854 = vmatmul.mubr.f32.vlgmr.msra.gmra.mrb[16].mxu0 %v1665_v23 }
 0x955   :  { %v1755_v34 = vpop.f32.mrb[16].mxu0 }
 0x956   :  { %v1756_v57 = vadd.f32 %v1803_v49, %v1755_v34  ;;  %v1855_v38 = vpop.f32.mrb[17].mxu0 }
 0x958   :  { %v1759_v20 = vmax.f32 %v1756_v57, 0.0 }
 0x95a   :  { %v1760_v62 = vmin.f32 %v1759_v20, 6.0 }
 0x95c   :  { %1761 = vst [vmem:[#allocation10] sm:$0xff] %v1760_v62 }
 0x95d   :  { %2632 = shalt.err (!%p2629_p8)
}
 0x95e   :  { %s2633_s5 = scalar_lea.hbm %s3251_s6, 128 }
 0x95f   :  { %p2634_p9 = scmp.ne.s32.totalorder %s3251_s6, %s2633_s5  ;;  %p2637_p10 = scmp.lt.u32.totalorder %s2633_s5, %s3251_s6 }
 0x961   :  { %p2639_p11 = pnand %p2637_p10, %p2634_p9 }
 0x963   :  { %2642 = shalt.err (!%p2639_p11)
}
 0x964   :  { %1771 = dma.vmem_to_hbm [thread:$0]  %s1769_s25, 128, %s3251_s6, [#allocation4]  }
 0x965   :  { %2649 = dma.done.wait [#allocation4], 128  }
 0x966   :  { %2650 = vsyncadd [#allocation4], 4294967168 }
 0x967   :  { %1775 = vsyncpa [#allocation3], 1 }
 0x968   :  { %1776 = vsyncpa [#allocation6], 1 }
 0x969   :  { %1777 = vsyncpa [#allocation9], 1 }
 0x96a   :  { %1778 = vsyncpa [#allocation4], 1 }

</bundles_post_ra>
